<compile_context>
chip_gen: v7x
topology: tpu7x:2x2x1
jax: 0.10.0
libtpu: 0.0.40
codegen_flags: <defaults>
</compile_context>

<pallas_src>
import functools
import math

import jax
import jax.numpy as jnp
from jax.experimental import pallas as pl
from jax.experimental.pallas import tpu as pltpu


# ----------------------------- helpers (in-kernel) --------------------------

def _layernorm(z, w, b, eps):
    mu = jnp.mean(z, axis=-1, keepdims=True)
    var = jnp.mean(jnp.square(z - mu), axis=-1, keepdims=True)
    return (z - mu) * jax.lax.rsqrt(var + eps) * w + b


# ----------------------------- Pallas kernels ------------------------------

def _embed_pe_kernel(src_ref, w_ref, b_ref, pe_ref, o_ref, *, scale):
    """o = (src @ W + b) * scale + pe   (pe broadcast over batch)."""
    bsz, s, i_dim = src_ref.shape
    d = w_ref.shape[1]
    x = src_ref[...].reshape(bsz * s, i_dim)
    y = jnp.dot(x, w_ref[...], preferred_element_type=jnp.float32) + b_ref[...]
    y = y * scale
    o_ref[...] = y.reshape(bsz, s, d) + pe_ref[...][None, :, :]


def embed_positional(src_bsi, w, b, pe_sd, *, scale):
    bsz, s, i_dim = src_bsi.shape
    d = w.shape[1]
    return pl.pallas_call(
        functools.partial(_embed_pe_kernel, scale=float(scale)),
        out_shape=jax.ShapeDtypeStruct((bsz, s, d), jnp.float32),
        grid=(1,),
        in_specs=[
            pl.BlockSpec((bsz, s, i_dim), lambda i: (0, 0, 0)),
            pl.BlockSpec((i_dim, d), lambda i: (0, 0)),
            pl.BlockSpec((1, d), lambda i: (0, 0)),
            pl.BlockSpec((s, d), lambda i: (0, 0)),
        ],
        out_specs=pl.BlockSpec((bsz, s, d), lambda i: (0, 0, 0)),
        compiler_params=pltpu.CompilerParams(dimension_semantics=("arbitrary",)),
    )(src_bsi, w, b.reshape(1, d), pe_sd)


def _encoder_layer_kernel(x_ref, in_w_ref, in_b_ref, out_w_ref, out_b_ref,
                          ln1_w_ref, ln1_b_ref, ff1_w_ref, ff1_b_ref,
                          ff2_w_ref, ff2_b_ref, ln2_w_ref, ln2_b_ref,
                          o_ref, *, num_heads, eps):
    """One whole post-norm TransformerEncoderLayer on a (B, S, D) slab."""
    bsz, s, d = x_ref.shape
    hd = d // num_heads
    rows = bsz * s
    att_scale = 1.0 / math.sqrt(hd)

    x = x_ref[...].reshape(rows, d)

    # --- fused QKV projection: one (rows, D) x (D, 3D) matmul ---
    qkv = jnp.dot(x, in_w_ref[...], preferred_element_type=jnp.float32) + in_b_ref[...]

    # --- multi-head self-attention; heads unrolled, batch handled by einsum.
    #     The out-projection is folded into the head loop:
    #     concat(heads) @ Wo == sum_h head_h @ Wo[h*hd:(h+1)*hd, :]
    out_w = out_w_ref[...]                                  # (D, D)
    attn = jnp.zeros((rows, d), jnp.float32)
    for h in range(num_heads):
        q = qkv[:, h * hd:(h + 1) * hd].reshape(bsz, s, hd)
        k = qkv[:, d + h * hd:d + (h + 1) * hd].reshape(bsz, s, hd)
        v = qkv[:, 2 * d + h * hd:2 * d + (h + 1) * hd].reshape(bsz, s, hd)
        sc = jnp.einsum('bqd,bkd->bqk', q, k,
                        preferred_element_type=jnp.float32) * att_scale
        m = jnp.max(sc, axis=-1, keepdims=True)
        p = jnp.exp(sc - m)
        p = p / jnp.sum(p, axis=-1, keepdims=True)
        o_h = jnp.einsum('bqk,bkd->bqd', p, v,
                         preferred_element_type=jnp.float32).reshape(rows, hd)
        attn = attn + jnp.dot(o_h, out_w[h * hd:(h + 1) * hd, :],
                              preferred_element_type=jnp.float32)
    attn = attn + out_b_ref[...]

    # --- residual + LayerNorm 1 (post-norm) ---
    z = _layernorm(x + attn, ln1_w_ref[...], ln1_b_ref[...], eps)

    # --- feed-forward: Linear -> ReLU -> Linear ---
    ff = jnp.dot(z, ff1_w_ref[...], preferred_element_type=jnp.float32) + ff1_b_ref[...]
    ff = jnp.maximum(ff, 0.0)
    ff = jnp.dot(ff, ff2_w_ref[...], preferred_element_type=jnp.float32) + ff2_b_ref[...]

    # --- residual + LayerNorm 2 ---
    z2 = _layernorm(z + ff, ln2_w_ref[...], ln2_b_ref[...], eps)

    o_ref[...] = z2.reshape(bsz, s, d)


def encoder_layer(x_bsd, lp, *, num_heads, eps=1e-5):
    bsz, s, d = x_bsd.shape
    dff = lp["ff1_w"].shape[1]
    spec3 = pl.BlockSpec((bsz, s, d), lambda i: (0, 0, 0))
    return pl.pallas_call(
        functools.partial(_encoder_layer_kernel, num_heads=num_heads, eps=float(eps)),
        out_shape=jax.ShapeDtypeStruct((bsz, s, d), jnp.float32),
        grid=(1,),
        in_specs=[
            spec3,
            pl.BlockSpec((d, 3 * d), lambda i: (0, 0)),   # in_w
            pl.BlockSpec((1, 3 * d), lambda i: (0, 0)),   # in_b
            pl.BlockSpec((d, d), lambda i: (0, 0)),       # out_w
            pl.BlockSpec((1, d), lambda i: (0, 0)),       # out_b
            pl.BlockSpec((1, d), lambda i: (0, 0)),       # ln1_w
            pl.BlockSpec((1, d), lambda i: (0, 0)),       # ln1_b
            pl.BlockSpec((d, dff), lambda i: (0, 0)),     # ff1_w
            pl.BlockSpec((1, dff), lambda i: (0, 0)),     # ff1_b
            pl.BlockSpec((dff, d), lambda i: (0, 0)),     # ff2_w
            pl.BlockSpec((1, d), lambda i: (0, 0)),       # ff2_b
            pl.BlockSpec((1, d), lambda i: (0, 0)),       # ln2_w
            pl.BlockSpec((1, d), lambda i: (0, 0)),       # ln2_b
        ],
        out_specs=spec3,
        compiler_params=pltpu.CompilerParams(dimension_semantics=("arbitrary",)),
    )(x_bsd,
      lp["in_w"], lp["in_b"].reshape(1, 3 * d),
      lp["out_w"], lp["out_b"].reshape(1, d),
      lp["ln1_w"].reshape(1, d), lp["ln1_b"].reshape(1, d),
      lp["ff1_w"], lp["ff1_b"].reshape(1, dff),
      lp["ff2_w"], lp["ff2_b"].reshape(1, d),
      lp["ln2_w"].reshape(1, d), lp["ln2_b"].reshape(1, d))


def _mean_decoder_kernel(x_ref, w_ref, b_ref, o_ref, *, inv_batch):
    """o = (mean over batch axis of x) @ W + b   with lane-dense (>=128) out."""
    x = x_ref[...]                                    # (B, S, D)
    xm = jnp.sum(x, axis=0) * inv_batch               # (S, D)
    o_ref[...] = jnp.dot(xm, w_ref[...], preferred_element_type=jnp.float32) + b_ref[...]


def mean_decoder(x_bsd, w_pad, b_pad):
    bsz, s, d = x_bsd.shape
    dout = w_pad.shape[1]
    return pl.pallas_call(
        functools.partial(_mean_decoder_kernel, inv_batch=1.0 / bsz),
        out_shape=jax.ShapeDtypeStruct((s, dout), jnp.float32),
        grid=(1,),
        in_specs=[
            pl.BlockSpec((bsz, s, d), lambda i: (0, 0, 0)),
            pl.BlockSpec((d, dout), lambda i: (0, 0)),
            pl.BlockSpec((1, dout), lambda i: (0, 0)),
        ],
        out_specs=pl.BlockSpec((s, dout), lambda i: (0, 0)),
        compiler_params=pltpu.CompilerParams(dimension_semantics=("arbitrary",)),
    )(x_bsd, w_pad, b_pad.reshape(1, dout))


# ------------------------- parameters & glue code ---------------------------

def make_positional_encoding(d_model, max_len=5000):
    position = jnp.arange(max_len, dtype=jnp.float32)[:, None]
    div_term = jnp.exp(jnp.arange(0, d_model, 2, dtype=jnp.float32)
                       * (-math.log(10000.0) / d_model))
    pe = jnp.zeros((max_len, d_model), dtype=jnp.float32)
    pe = pe.at[:, 0::2].set(jnp.sin(position * div_term))
    pe = pe.at[:, 1::2].set(jnp.cos(position * div_term))
    return pe                                          # (max_len, d_model)


def init_params(key, input_dim, model_dim, num_heads, num_layers, output_dim):
    assert model_dim % num_heads == 0
    ks = jax.random.split(key, 2 + num_layers)

    def dense(k, din, dout):
        w = jax.random.normal(k, (din, dout), jnp.float32) * 0.02
        b = jnp.zeros((dout,), jnp.float32)
        return w, b

    params = {}
    params["embed_w"], params["embed_b"] = dense(ks[0], input_dim, model_dim)

    # decoder weights, padded to a lane-dense (>=128) output width
    dec_w, dec_b = dense(ks[1], model_dim, output_dim)
    dpad = max(128, ((output_dim + 127) // 128) * 128)
    params["dec_w_pad"] = jnp.zeros((model_dim, dpad), jnp.float32).at[:, :output_dim].set(dec_w)
    params["dec_b_pad"] = jnp.zeros((dpad,), jnp.float32).at[:output_dim].set(dec_b)

    # positional-encoding table, precomputed once (hoisted out of forward)
    params["pe"] = make_positional_encoding(model_dim)

    layers = []
    for l in range(num_layers):
        lk = jax.random.split(ks[2 + l], 4)
        in_w, in_b = dense(lk[0], model_dim, 3 * model_dim)       # qkv in-proj
        out_w, out_b = dense(lk[1], model_dim, model_dim)         # attn out-proj
        ff1_w, ff1_b = dense(lk[2], model_dim, 4 * model_dim)     # dim_feedforward = 4*D
        ff2_w, ff2_b = dense(lk[3], 4 * model_dim, model_dim)
        layers.append(dict(
            in_w=in_w, in_b=in_b, out_w=out_w, out_b=out_b,
            ff1_w=ff1_w, ff1_b=ff1_b, ff2_w=ff2_w, ff2_b=ff2_b,
            ln1_w=jnp.ones((model_dim,), jnp.float32),
            ln1_b=jnp.zeros((model_dim,), jnp.float32),
            ln2_w=jnp.ones((model_dim,), jnp.float32),
            ln2_b=jnp.zeros((model_dim,), jnp.float32),
        ))
    params["layers"] = layers
    return params


def transformer_forward(params, src, *, num_heads, output_dim):
    """src: (S, B, input_dim) float32 -> (S, output_dim) float32."""
    S, B, I = src.shape
    D = params["embed_w"].shape[1]

    # single one-time layout change to batch-major; everything after runs on
    # (B, S, .) slabs entirely inside fused Pallas kernels.
    src_b = jnp.transpose(src, (1, 0, 2))              # (B, S, I)
    pe = params["pe"][:S]                              # (S, D)

    # embedding(src) * sqrt(src.size(1))  (== sqrt(B) in seq-first layout)
    # + positional encoding (dropout -> identity in eval), all in one kernel.
    x = embed_positional(src_b, params["embed_w"], params["embed_b"], pe,
                         scale=math.sqrt(B))

    # one fused pallas_call per encoder layer
    for lp in params["layers"]:
        x = encoder_layer(x, lp, num_heads=num_heads)

    # decoder(output.mean(dim=1)) fused; output padded to 128 lanes in-kernel
    out_pad = mean_decoder(x, params["dec_w_pad"], params["dec_b_pad"])
    return out_pad[:, :output_dim]


# ---------------------------------- main ------------------------------------

if __name__ == "__main__":
    S, B = 8, 2                  # seq len, batch
    INPUT_DIM, MODEL_DIM = 16, 32
    NUM_HEADS, NUM_LAYERS, OUTPUT_DIM = 4, 2, 8

    key = jax.random.PRNGKey(0)
    pkey, xkey = jax.random.split(key)
    params = init_params(pkey, INPUT_DIM, MODEL_DIM, NUM_HEADS, NUM_LAYERS, OUTPUT_DIM)
    src = jax.random.normal(xkey, (S, B, INPUT_DIM), jnp.float32)

    fwd = jax.jit(functools.partial(transformer_forward,
                                    num_heads=NUM_HEADS, output_dim=OUTPUT_DIM))
    out = fwd(params, src)
    out = jax.block_until_ready(out)

    assert out.shape == (S, OUTPUT_DIM), out.shape
    assert bool(jnp.all(jnp.isfinite(out)))
    print("KERNEL_OK")
</pallas_src>

<mosaic_0001>
module attributes {stable_mosaic.version = 11 : i64} {
  func.func @_encoder_layer_kernel(%arg0: i32, %arg1: memref<2x8x32xf32, #tpu.memory_space<vmem>>, %arg2: memref<32x96xf32, #tpu.memory_space<vmem>>, %arg3: memref<1x96xf32, #tpu.memory_space<vmem>>, %arg4: memref<32x32xf32, #tpu.memory_space<vmem>>, %arg5: memref<1x32xf32, #tpu.memory_space<vmem>>, %arg6: memref<1x32xf32, #tpu.memory_space<vmem>>, %arg7: memref<1x32xf32, #tpu.memory_space<vmem>>, %arg8: memref<32x128xf32, #tpu.memory_space<vmem>>, %arg9: memref<1x128xf32, #tpu.memory_space<vmem>>, %arg10: memref<128x32xf32, #tpu.memory_space<vmem>>, %arg11: memref<1x32xf32, #tpu.memory_space<vmem>>, %arg12: memref<1x32xf32, #tpu.memory_space<vmem>>, %arg13: memref<1x32xf32, #tpu.memory_space<vmem>>, %arg14: memref<2x8x32xf32, #tpu.memory_space<vmem>>) attributes {dimension_semantics = [#tpu.dimension_semantics<arbitrary>], iteration_bounds = array<i64: 1>, scalar_prefetch = 0 : i64, scratch_operands = 0 : i64, tpu.core_type = #tpu.core_type<tc>, window_params = [{pipeline_mode = #tpu.pipeline_mode<synchronous>, transform_indices = @transform_0, window_bounds = array<i64: 2, 8, 32>}, {pipeline_mode = #tpu.pipeline_mode<synchronous>, transform_indices = @transform_1, window_bounds = array<i64: 32, 96>}, {pipeline_mode = #tpu.pipeline_mode<synchronous>, transform_indices = @transform_2, window_bounds = array<i64: 1, 96>}, {pipeline_mode = #tpu.pipeline_mode<synchronous>, transform_indices = @transform_3, window_bounds = array<i64: 32, 32>}, {pipeline_mode = #tpu.pipeline_mode<synchronous>, transform_indices = @transform_4, window_bounds = array<i64: 1, 32>}, {pipeline_mode = #tpu.pipeline_mode<synchronous>, transform_indices = @transform_5, window_bounds = array<i64: 1, 32>}, {pipeline_mode = #tpu.pipeline_mode<synchronous>, transform_indices = @transform_6, window_bounds = array<i64: 1, 32>}, {pipeline_mode = #tpu.pipeline_mode<synchronous>, transform_indices = @transform_7, window_bounds = array<i64: 32, 128>}, {pipeline_mode = #tpu.pipeline_mode<synchronous>, transform_indices = @transform_8, window_bounds = array<i64: 1, 128>}, {pipeline_mode = #tpu.pipeline_mode<synchronous>, transform_indices = @transform_9, window_bounds = array<i64: 128, 32>}, {pipeline_mode = #tpu.pipeline_mode<synchronous>, transform_indices = @transform_10, window_bounds = array<i64: 1, 32>}, {pipeline_mode = #tpu.pipeline_mode<synchronous>, transform_indices = @transform_11, window_bounds = array<i64: 1, 32>}, {pipeline_mode = #tpu.pipeline_mode<synchronous>, transform_indices = @transform_12, window_bounds = array<i64: 1, 32>}, {pipeline_mode = #tpu.pipeline_mode<synchronous>, transform_indices = @transform_13, window_bounds = array<i64: 2, 8, 32>}]} {
    %c0 = arith.constant 0 : index
    %c0_0 = arith.constant 0 : index
    %c0_1 = arith.constant 0 : index
    %0 = vector.load %arg1[%c0, %c0_0, %c0_1] : memref<2x8x32xf32, #tpu.memory_space<vmem>>, vector<2x8x32xf32>
    %1 = vector.shape_cast %0 : vector<2x8x32xf32> to vector<16x32xf32>
    %c0_2 = arith.constant 0 : index
    %c0_3 = arith.constant 0 : index
    %2 = vector.load %arg2[%c0_2, %c0_3] : memref<32x96xf32, #tpu.memory_space<vmem>>, vector<32x96xf32>
    %cst = arith.constant dense<0.000000e+00> : vector<16x96xf32>
    %3 = tpu.matmul %1, %2, %cst {dimension_numbers = #tpu.dot_dimension_numbers<[1], [0], [0], [1], [0, 0, 1, 1], [], []>} : vector<16x32xf32>, vector<32x96xf32>, vector<16x96xf32> -> vector<16x96xf32>
    %c0_4 = arith.constant 0 : index
    %c0_5 = arith.constant 0 : index
    %4 = vector.load %arg3[%c0_4, %c0_5] : memref<1x96xf32, #tpu.memory_space<vmem>>, vector<1x96xf32>
    %5 = vector.broadcast %4 : vector<1x96xf32> to vector<16x96xf32>
    %6 = arith.addf %3, %5 : vector<16x96xf32>
    %c0_6 = arith.constant 0 : index
    %c0_7 = arith.constant 0 : index
    %7 = vector.load %arg4[%c0_6, %c0_7] : memref<32x32xf32, #tpu.memory_space<vmem>>, vector<32x32xf32>
    %cst_8 = arith.constant 0.000000e+00 : f32
    %8 = vector.broadcast %cst_8 : f32 to vector<16x32xf32>
    %9 = vector.extract_strided_slice %6 {offsets = [0, 0], sizes = [16, 8], strides = [1, 1]} : vector<16x96xf32> to vector<16x8xf32>
    %10 = vector.shape_cast %9 : vector<16x8xf32> to vector<2x8x8xf32>
    %11 = vector.extract_strided_slice %6 {offsets = [0, 32], sizes = [16, 8], strides = [1, 1]} : vector<16x96xf32> to vector<16x8xf32>
    %12 = vector.shape_cast %11 : vector<16x8xf32> to vector<2x8x8xf32>
    %13 = vector.extract_strided_slice %6 {offsets = [0, 64], sizes = [16, 8], strides = [1, 1]} : vector<16x96xf32> to vector<16x8xf32>
    %14 = vector.shape_cast %13 : vector<16x8xf32> to vector<2x8x8xf32>
    "tpu.trace_start"() <{level = 10 : i32, message = "bqd,bkd->bqk"}> : () -> ()
    %cst_9 = arith.constant dense<0.000000e+00> : vector<2x8x8xf32>
    %15 = tpu.matmul %10, %12, %cst_9 {dimension_numbers = #tpu.dot_dimension_numbers<[2], [2], [1], [1], [0, 0, 0, 1, 1, 1], [0], [0]>} : vector<2x8x8xf32>, vector<2x8x8xf32>, vector<2x8x8xf32> -> vector<2x8x8xf32>
    "tpu.trace_stop"() : () -> ()
    %cst_10 = arith.constant 0.353553385 : f32
    %16 = vector.broadcast %cst_10 : f32 to vector<2x8x8xf32>
    %17 = arith.mulf %15, %16 : vector<2x8x8xf32>
    %cst_11 = arith.constant dense<0xFF800000> : vector<2x8xf32>
    %18 = vector.multi_reduction <maximumf>, %17, %cst_11 [2] : vector<2x8x8xf32> to vector<2x8xf32>
    %19 = vector.shape_cast %18 : vector<2x8xf32> to vector<2x8x1xf32>
    %20 = vector.broadcast %19 : vector<2x8x1xf32> to vector<2x8x8xf32>
    %21 = arith.subf %17, %20 : vector<2x8x8xf32>
    %22 = math.exp %21 : vector<2x8x8xf32>
    %cst_12 = arith.constant dense<0.000000e+00> : vector<2x8xf32>
    %23 = vector.multi_reduction <add>, %22, %cst_12 [2] : vector<2x8x8xf32> to vector<2x8xf32>
    %24 = vector.shape_cast %23 : vector<2x8xf32> to vector<2x8x1xf32>
    %25 = vector.broadcast %24 : vector<2x8x1xf32> to vector<2x8x8xf32>
    %26 = arith.divf %22, %25 : vector<2x8x8xf32>
    "tpu.trace_start"() <{level = 10 : i32, message = "bqk,bkd->bqd"}> : () -> ()
    %cst_13 = arith.constant dense<0.000000e+00> : vector<2x8x8xf32>
    %27 = tpu.matmul %26, %14, %cst_13 {dimension_numbers = #tpu.dot_dimension_numbers<[2], [1], [1], [2], [0, 0, 0, 1, 1, 2], [0], [0]>} : vector<2x8x8xf32>, vector<2x8x8xf32>, vector<2x8x8xf32> -> vector<2x8x8xf32>
    "tpu.trace_stop"() : () -> ()
    %28 = vector.shape_cast %27 : vector<2x8x8xf32> to vector<16x8xf32>
    %29 = vector.extract_strided_slice %7 {offsets = [0, 0], sizes = [8, 32], strides = [1, 1]} : vector<32x32xf32> to vector<8x32xf32>
    %cst_14 = arith.constant dense<0.000000e+00> : vector<16x32xf32>
    %30 = tpu.matmul %28, %29, %cst_14 {dimension_numbers = #tpu.dot_dimension_numbers<[1], [0], [0], [1], [0, 0, 1, 1], [], []>} : vector<16x8xf32>, vector<8x32xf32>, vector<16x32xf32> -> vector<16x32xf32>
    %31 = arith.addf %8, %30 : vector<16x32xf32>
    %32 = vector.extract_strided_slice %6 {offsets = [0, 8], sizes = [16, 8], strides = [1, 1]} : vector<16x96xf32> to vector<16x8xf32>
    %33 = vector.shape_cast %32 : vector<16x8xf32> to vector<2x8x8xf32>
    %34 = vector.extract_strided_slice %6 {offsets = [0, 40], sizes = [16, 8], strides = [1, 1]} : vector<16x96xf32> to vector<16x8xf32>
    %35 = vector.shape_cast %34 : vector<16x8xf32> to vector<2x8x8xf32>
    %36 = vector.extract_strided_slice %6 {offsets = [0, 72], sizes = [16, 8], strides = [1, 1]} : vector<16x96xf32> to vector<16x8xf32>
    %37 = vector.shape_cast %36 : vector<16x8xf32> to vector<2x8x8xf32>
    "tpu.trace_start"() <{level = 10 : i32, message = "bqd,bkd->bqk"}> : () -> ()
    %cst_15 = arith.constant dense<0.000000e+00> : vector<2x8x8xf32>
    %38 = tpu.matmul %33, %35, %cst_15 {dimension_numbers = #tpu.dot_dimension_numbers<[2], [2], [1], [1], [0, 0, 0, 1, 1, 1], [0], [0]>} : vector<2x8x8xf32>, vector<2x8x8xf32>, vector<2x8x8xf32> -> vector<2x8x8xf32>
    "tpu.trace_stop"() : () -> ()
    %cst_16 = arith.constant 0.353553385 : f32
    %39 = vector.broadcast %cst_16 : f32 to vector<2x8x8xf32>
    %40 = arith.mulf %38, %39 : vector<2x8x8xf32>
    %cst_17 = arith.constant dense<0xFF800000> : vector<2x8xf32>
    %41 = vector.multi_reduction <maximumf>, %40, %cst_17 [2] : vector<2x8x8xf32> to vector<2x8xf32>
    %42 = vector.shape_cast %41 : vector<2x8xf32> to vector<2x8x1xf32>
    %43 = vector.broadcast %42 : vector<2x8x1xf32> to vector<2x8x8xf32>
    %44 = arith.subf %40, %43 : vector<2x8x8xf32>
    %45 = math.exp %44 : vector<2x8x8xf32>
    %cst_18 = arith.constant dense<0.000000e+00> : vector<2x8xf32>
    %46 = vector.multi_reduction <add>, %45, %cst_18 [2] : vector<2x8x8xf32> to vector<2x8xf32>
    %47 = vector.shape_cast %46 : vector<2x8xf32> to vector<2x8x1xf32>
    %48 = vector.broadcast %47 : vector<2x8x1xf32> to vector<2x8x8xf32>
    %49 = arith.divf %45, %48 : vector<2x8x8xf32>
    "tpu.trace_start"() <{level = 10 : i32, message = "bqk,bkd->bqd"}> : () -> ()
    %cst_19 = arith.constant dense<0.000000e+00> : vector<2x8x8xf32>
    %50 = tpu.matmul %49, %37, %cst_19 {dimension_numbers = #tpu.dot_dimension_numbers<[2], [1], [1], [2], [0, 0, 0, 1, 1, 2], [0], [0]>} : vector<2x8x8xf32>, vector<2x8x8xf32>, vector<2x8x8xf32> -> vector<2x8x8xf32>
    "tpu.trace_stop"() : () -> ()
    %51 = vector.shape_cast %50 : vector<2x8x8xf32> to vector<16x8xf32>
    %52 = vector.extract_strided_slice %7 {offsets = [8, 0], sizes = [8, 32], strides = [1, 1]} : vector<32x32xf32> to vector<8x32xf32>
    %cst_20 = arith.constant dense<0.000000e+00> : vector<16x32xf32>
    %53 = tpu.matmul %51, %52, %cst_20 {dimension_numbers = #tpu.dot_dimension_numbers<[1], [0], [0], [1], [0, 0, 1, 1], [], []>} : vector<16x8xf32>, vector<8x32xf32>, vector<16x32xf32> -> vector<16x32xf32>
    %54 = arith.addf %31, %53 : vector<16x32xf32>
    %55 = vector.extract_strided_slice %6 {offsets = [0, 16], sizes = [16, 8], strides = [1, 1]} : vector<16x96xf32> to vector<16x8xf32>
    %56 = vector.shape_cast %55 : vector<16x8xf32> to vector<2x8x8xf32>
    %57 = vector.extract_strided_slice %6 {offsets = [0, 48], sizes = [16, 8], strides = [1, 1]} : vector<16x96xf32> to vector<16x8xf32>
    %58 = vector.shape_cast %57 : vector<16x8xf32> to vector<2x8x8xf32>
    %59 = vector.extract_strided_slice %6 {offsets = [0, 80], sizes = [16, 8], strides = [1, 1]} : vector<16x96xf32> to vector<16x8xf32>
    %60 = vector.shape_cast %59 : vector<16x8xf32> to vector<2x8x8xf32>
    "tpu.trace_start"() <{level = 10 : i32, message = "bqd,bkd->bqk"}> : () -> ()
    %cst_21 = arith.constant dense<0.000000e+00> : vector<2x8x8xf32>
    %61 = tpu.matmul %56, %58, %cst_21 {dimension_numbers = #tpu.dot_dimension_numbers<[2], [2], [1], [1], [0, 0, 0, 1, 1, 1], [0], [0]>} : vector<2x8x8xf32>, vector<2x8x8xf32>, vector<2x8x8xf32> -> vector<2x8x8xf32>
    "tpu.trace_stop"() : () -> ()
    %cst_22 = arith.constant 0.353553385 : f32
    %62 = vector.broadcast %cst_22 : f32 to vector<2x8x8xf32>
    %63 = arith.mulf %61, %62 : vector<2x8x8xf32>
    %cst_23 = arith.constant dense<0xFF800000> : vector<2x8xf32>
    %64 = vector.multi_reduction <maximumf>, %63, %cst_23 [2] : vector<2x8x8xf32> to vector<2x8xf32>
    %65 = vector.shape_cast %64 : vector<2x8xf32> to vector<2x8x1xf32>
    %66 = vector.broadcast %65 : vector<2x8x1xf32> to vector<2x8x8xf32>
    %67 = arith.subf %63, %66 : vector<2x8x8xf32>
    %68 = math.exp %67 : vector<2x8x8xf32>
    %cst_24 = arith.constant dense<0.000000e+00> : vector<2x8xf32>
    %69 = vector.multi_reduction <add>, %68, %cst_24 [2] : vector<2x8x8xf32> to vector<2x8xf32>
    %70 = vector.shape_cast %69 : vector<2x8xf32> to vector<2x8x1xf32>
    %71 = vector.broadcast %70 : vector<2x8x1xf32> to vector<2x8x8xf32>
    %72 = arith.divf %68, %71 : vector<2x8x8xf32>
    "tpu.trace_start"() <{level = 10 : i32, message = "bqk,bkd->bqd"}> : () -> ()
    %cst_25 = arith.constant dense<0.000000e+00> : vector<2x8x8xf32>
    %73 = tpu.matmul %72, %60, %cst_25 {dimension_numbers = #tpu.dot_dimension_numbers<[2], [1], [1], [2], [0, 0, 0, 1, 1, 2], [0], [0]>} : vector<2x8x8xf32>, vector<2x8x8xf32>, vector<2x8x8xf32> -> vector<2x8x8xf32>
    "tpu.trace_stop"() : () -> ()
    %74 = vector.shape_cast %73 : vector<2x8x8xf32> to vector<16x8xf32>
    %75 = vector.extract_strided_slice %7 {offsets = [16, 0], sizes = [8, 32], strides = [1, 1]} : vector<32x32xf32> to vector<8x32xf32>
    %cst_26 = arith.constant dense<0.000000e+00> : vector<16x32xf32>
    %76 = tpu.matmul %74, %75, %cst_26 {dimension_numbers = #tpu.dot_dimension_numbers<[1], [0], [0], [1], [0, 0, 1, 1], [], []>} : vector<16x8xf32>, vector<8x32xf32>, vector<16x32xf32> -> vector<16x32xf32>
    %77 = arith.addf %54, %76 : vector<16x32xf32>
    %78 = vector.extract_strided_slice %6 {offsets = [0, 24], sizes = [16, 8], strides = [1, 1]} : vector<16x96xf32> to vector<16x8xf32>
    %79 = vector.shape_cast %78 : vector<16x8xf32> to vector<2x8x8xf32>
    %80 = vector.extract_strided_slice %6 {offsets = [0, 56], sizes = [16, 8], strides = [1, 1]} : vector<16x96xf32> to vector<16x8xf32>
    %81 = vector.shape_cast %80 : vector<16x8xf32> to vector<2x8x8xf32>
    %82 = vector.extract_strided_slice %6 {offsets = [0, 88], sizes = [16, 8], strides = [1, 1]} : vector<16x96xf32> to vector<16x8xf32>
    %83 = vector.shape_cast %82 : vector<16x8xf32> to vector<2x8x8xf32>
    "tpu.trace_start"() <{level = 10 : i32, message = "bqd,bkd->bqk"}> : () -> ()
    %cst_27 = arith.constant dense<0.000000e+00> : vector<2x8x8xf32>
    %84 = tpu.matmul %79, %81, %cst_27 {dimension_numbers = #tpu.dot_dimension_numbers<[2], [2], [1], [1], [0, 0, 0, 1, 1, 1], [0], [0]>} : vector<2x8x8xf32>, vector<2x8x8xf32>, vector<2x8x8xf32> -> vector<2x8x8xf32>
    "tpu.trace_stop"() : () -> ()
    %cst_28 = arith.constant 0.353553385 : f32
    %85 = vector.broadcast %cst_28 : f32 to vector<2x8x8xf32>
    %86 = arith.mulf %84, %85 : vector<2x8x8xf32>
    %cst_29 = arith.constant dense<0xFF800000> : vector<2x8xf32>
    %87 = vector.multi_reduction <maximumf>, %86, %cst_29 [2] : vector<2x8x8xf32> to vector<2x8xf32>
    %88 = vector.shape_cast %87 : vector<2x8xf32> to vector<2x8x1xf32>
    %89 = vector.broadcast %88 : vector<2x8x1xf32> to vector<2x8x8xf32>
    %90 = arith.subf %86, %89 : vector<2x8x8xf32>
    %91 = math.exp %90 : vector<2x8x8xf32>
    %cst_30 = arith.constant dense<0.000000e+00> : vector<2x8xf32>
    %92 = vector.multi_reduction <add>, %91, %cst_30 [2] : vector<2x8x8xf32> to vector<2x8xf32>
    %93 = vector.shape_cast %92 : vector<2x8xf32> to vector<2x8x1xf32>
    %94 = vector.broadcast %93 : vector<2x8x1xf32> to vector<2x8x8xf32>
    %95 = arith.divf %91, %94 : vector<2x8x8xf32>
    "tpu.trace_start"() <{level = 10 : i32, message = "bqk,bkd->bqd"}> : () -> ()
    %cst_31 = arith.constant dense<0.000000e+00> : vector<2x8x8xf32>
    %96 = tpu.matmul %95, %83, %cst_31 {dimension_numbers = #tpu.dot_dimension_numbers<[2], [1], [1], [2], [0, 0, 0, 1, 1, 2], [0], [0]>} : vector<2x8x8xf32>, vector<2x8x8xf32>, vector<2x8x8xf32> -> vector<2x8x8xf32>
    "tpu.trace_stop"() : () -> ()
    %97 = vector.shape_cast %96 : vector<2x8x8xf32> to vector<16x8xf32>
    %98 = vector.extract_strided_slice %7 {offsets = [24, 0], sizes = [8, 32], strides = [1, 1]} : vector<32x32xf32> to vector<8x32xf32>
    %cst_32 = arith.constant dense<0.000000e+00> : vector<16x32xf32>
    %99 = tpu.matmul %97, %98, %cst_32 {dimension_numbers = #tpu.dot_dimension_numbers<[1], [0], [0], [1], [0, 0, 1, 1], [], []>} : vector<16x8xf32>, vector<8x32xf32>, vector<16x32xf32> -> vector<16x32xf32>
    %100 = arith.addf %77, %99 : vector<16x32xf32>
    %c0_33 = arith.constant 0 : index
    %c0_34 = arith.constant 0 : index
    %101 = vector.load %arg5[%c0_33, %c0_34] : memref<1x32xf32, #tpu.memory_space<vmem>>, vector<1x32xf32>
    %102 = vector.broadcast %101 : vector<1x32xf32> to vector<16x32xf32>
    %103 = arith.addf %100, %102 : vector<16x32xf32>
    %104 = arith.addf %1, %103 : vector<16x32xf32>
    %c0_35 = arith.constant 0 : index
    %c0_36 = arith.constant 0 : index
    %105 = vector.load %arg6[%c0_35, %c0_36] : memref<1x32xf32, #tpu.memory_space<vmem>>, vector<1x32xf32>
    %c0_37 = arith.constant 0 : index
    %c0_38 = arith.constant 0 : index
    %106 = vector.load %arg7[%c0_37, %c0_38] : memref<1x32xf32, #tpu.memory_space<vmem>>, vector<1x32xf32>
    %cst_39 = arith.constant dense<0.000000e+00> : vector<16xf32>
    %107 = vector.multi_reduction <add>, %104, %cst_39 [1] : vector<16x32xf32> to vector<16xf32>
    %108 = vector.shape_cast %107 : vector<16xf32> to vector<16x1xf32>
    %cst_40 = arith.constant 3.200000e+01 : f32
    %109 = vector.broadcast %cst_40 : f32 to vector<16x1xf32>
    %110 = arith.divf %108, %109 : vector<16x1xf32>
    %111 = vector.broadcast %110 : vector<16x1xf32> to vector<16x32xf32>
    %112 = arith.subf %104, %111 : vector<16x32xf32>
    %113 = arith.mulf %112, %112 : vector<16x32xf32>
    %cst_41 = arith.constant dense<0.000000e+00> : vector<16xf32>
    %114 = vector.multi_reduction <add>, %113, %cst_41 [1] : vector<16x32xf32> to vector<16xf32>
    %115 = vector.shape_cast %114 : vector<16xf32> to vector<16x1xf32>
    %cst_42 = arith.constant 3.200000e+01 : f32
    %116 = vector.broadcast %cst_42 : f32 to vector<16x1xf32>
    %117 = arith.divf %115, %116 : vector<16x1xf32>
    %118 = vector.broadcast %110 : vector<16x1xf32> to vector<16x32xf32>
    %119 = arith.subf %104, %118 : vector<16x32xf32>
    %cst_43 = arith.constant 9.99999974E-6 : f32
    %120 = vector.broadcast %cst_43 : f32 to vector<16x1xf32>
    %121 = arith.addf %117, %120 : vector<16x1xf32>
    %122 = math.rsqrt %121 : vector<16x1xf32>
    %123 = vector.broadcast %122 : vector<16x1xf32> to vector<16x32xf32>
    %124 = arith.mulf %119, %123 : vector<16x32xf32>
    %125 = vector.broadcast %105 : vector<1x32xf32> to vector<16x32xf32>
    %126 = arith.mulf %124, %125 : vector<16x32xf32>
    %127 = vector.broadcast %106 : vector<1x32xf32> to vector<16x32xf32>
    %128 = arith.addf %126, %127 : vector<16x32xf32>
    %c0_44 = arith.constant 0 : index
    %c0_45 = arith.constant 0 : index
    %129 = vector.load %arg8[%c0_44, %c0_45] : memref<32x128xf32, #tpu.memory_space<vmem>>, vector<32x128xf32>
    %cst_46 = arith.constant dense<0.000000e+00> : vector<16x128xf32>
    %130 = tpu.matmul %128, %129, %cst_46 {dimension_numbers = #tpu.dot_dimension_numbers<[1], [0], [0], [1], [0, 0, 1, 1], [], []>} : vector<16x32xf32>, vector<32x128xf32>, vector<16x128xf32> -> vector<16x128xf32>
    %c0_47 = arith.constant 0 : index
    %c0_48 = arith.constant 0 : index
    %131 = vector.load %arg9[%c0_47, %c0_48] : memref<1x128xf32, #tpu.memory_space<vmem>>, vector<1x128xf32>
    %132 = vector.broadcast %131 : vector<1x128xf32> to vector<16x128xf32>
    %133 = arith.addf %130, %132 : vector<16x128xf32>
    %cst_49 = arith.constant 0.000000e+00 : f32
    %134 = vector.broadcast %cst_49 : f32 to vector<16x128xf32>
    %135 = arith.maximumf %133, %134 : vector<16x128xf32>
    %c0_50 = arith.constant 0 : index
    %c0_51 = arith.constant 0 : index
    %136 = vector.load %arg10[%c0_50, %c0_51] : memref<128x32xf32, #tpu.memory_space<vmem>>, vector<128x32xf32>
    %cst_52 = arith.constant dense<0.000000e+00> : vector<16x32xf32>
    %137 = tpu.matmul %135, %136, %cst_52 {dimension_numbers = #tpu.dot_dimension_numbers<[1], [0], [0], [1], [0, 0, 1, 1], [], []>} : vector<16x128xf32>, vector<128x32xf32>, vector<16x32xf32> -> vector<16x32xf32>
    %c0_53 = arith.constant 0 : index
    %c0_54 = arith.constant 0 : index
    %138 = vector.load %arg11[%c0_53, %c0_54] : memref<1x32xf32, #tpu.memory_space<vmem>>, vector<1x32xf32>
    %139 = vector.broadcast %138 : vector<1x32xf32> to vector<16x32xf32>
    %140 = arith.addf %137, %139 : vector<16x32xf32>
    %141 = arith.addf %128, %140 : vector<16x32xf32>
    %c0_55 = arith.constant 0 : index
    %c0_56 = arith.constant 0 : index
    %142 = vector.load %arg12[%c0_55, %c0_56] : memref<1x32xf32, #tpu.memory_space<vmem>>, vector<1x32xf32>
    %c0_57 = arith.constant 0 : index
    %c0_58 = arith.constant 0 : index
    %143 = vector.load %arg13[%c0_57, %c0_58] : memref<1x32xf32, #tpu.memory_space<vmem>>, vector<1x32xf32>
    %cst_59 = arith.constant dense<0.000000e+00> : vector<16xf32>
    %144 = vector.multi_reduction <add>, %141, %cst_59 [1] : vector<16x32xf32> to vector<16xf32>
    %145 = vector.shape_cast %144 : vector<16xf32> to vector<16x1xf32>
    %cst_60 = arith.constant 3.200000e+01 : f32
    %146 = vector.broadcast %cst_60 : f32 to vector<16x1xf32>
    %147 = arith.divf %145, %146 : vector<16x1xf32>
    %148 = vector.broadcast %147 : vector<16x1xf32> to vector<16x32xf32>
    %149 = arith.subf %141, %148 : vector<16x32xf32>
    %150 = arith.mulf %149, %149 : vector<16x32xf32>
    %cst_61 = arith.constant dense<0.000000e+00> : vector<16xf32>
    %151 = vector.multi_reduction <add>, %150, %cst_61 [1] : vector<16x32xf32> to vector<16xf32>
    %152 = vector.shape_cast %151 : vector<16xf32> to vector<16x1xf32>
    %cst_62 = arith.constant 3.200000e+01 : f32
    %153 = vector.broadcast %cst_62 : f32 to vector<16x1xf32>
    %154 = arith.divf %152, %153 : vector<16x1xf32>
    %155 = vector.broadcast %147 : vector<16x1xf32> to vector<16x32xf32>
    %156 = arith.subf %141, %155 : vector<16x32xf32>
    %cst_63 = arith.constant 9.99999974E-6 : f32
    %157 = vector.broadcast %cst_63 : f32 to vector<16x1xf32>
    %158 = arith.addf %154, %157 : vector<16x1xf32>
    %159 = math.rsqrt %158 : vector<16x1xf32>
    %160 = vector.broadcast %159 : vector<16x1xf32> to vector<16x32xf32>
    %161 = arith.mulf %156, %160 : vector<16x32xf32>
    %162 = vector.broadcast %142 : vector<1x32xf32> to vector<16x32xf32>
    %163 = arith.mulf %161, %162 : vector<16x32xf32>
    %164 = vector.broadcast %143 : vector<1x32xf32> to vector<16x32xf32>
    %165 = arith.addf %163, %164 : vector<16x32xf32>
    %166 = vector.shape_cast %165 : vector<16x32xf32> to vector<2x8x32xf32>
    %c0_64 = arith.constant 0 : index
    %c0_65 = arith.constant 0 : index
    %c0_66 = arith.constant 0 : index
    %167 = vector.load %arg14[%c0_64, %c0_65, %c0_66] : memref<2x8x32xf32, #tpu.memory_space<vmem>>, vector<2x8x32xf32>
    tpu.vector_store %arg14[%c0_64, %c0_65, %c0_66], %166 {strides = array<i32>} : memref<2x8x32xf32, #tpu.memory_space<vmem>>, vector<2x8x32xf32>,
    return
  }
  func.func @transform_0(%arg0: i32) -> (i32, i32, i32) {
    %c0_i32 = arith.constant 0 : i32
    %c0_i32_0 = arith.constant 0 : i32
    %c0_i32_1 = arith.constant 0 : i32
    %c0_i32_2 = arith.constant 0 : i32
    return %c0_i32, %c0_i32_0, %c0_i32_1 : i32, i32, i32
  }
  func.func @transform_1(%arg0: i32) -> (i32, i32) {
    %c0_i32 = arith.constant 0 : i32
    %c0_i32_0 = arith.constant 0 : i32
    %c0_i32_1 = arith.constant 0 : i32
    return %c0_i32, %c0_i32_0 : i32, i32
  }
  func.func @transform_2(%arg0: i32) -> (i32, i32) {
    %c0_i32 = arith.constant 0 : i32
    %c0_i32_0 = arith.constant 0 : i32
    %c0_i32_1 = arith.constant 0 : i32
    return %c0_i32, %c0_i32_0 : i32, i32
  }
  func.func @transform_3(%arg0: i32) -> (i32, i32) {
    %c0_i32 = arith.constant 0 : i32
    %c0_i32_0 = arith.constant 0 : i32
    %c0_i32_1 = arith.constant 0 : i32
    return %c0_i32, %c0_i32_0 : i32, i32
  }
  func.func @transform_4(%arg0: i32) -> (i32, i32) {
    %c0_i32 = arith.constant 0 : i32
    %c0_i32_0 = arith.constant 0 : i32
    %c0_i32_1 = arith.constant 0 : i32
    return %c0_i32, %c0_i32_0 : i32, i32
  }
  func.func @transform_5(%arg0: i32) -> (i32, i32) {
    %c0_i32 = arith.constant 0 : i32
    %c0_i32_0 = arith.constant 0 : i32
    %c0_i32_1 = arith.constant 0 : i32
    return %c0_i32, %c0_i32_0 : i32, i32
  }
  func.func @transform_6(%arg0: i32) -> (i32, i32) {
    %c0_i32 = arith.constant 0 : i32
    %c0_i32_0 = arith.constant 0 : i32
    %c0_i32_1 = arith.constant 0 : i32
    return %c0_i32, %c0_i32_0 : i32, i32
  }
  func.func @transform_7(%arg0: i32) -> (i32, i32) {
    %c0_i32 = arith.constant 0 : i32
    %c0_i32_0 = arith.constant 0 : i32
    %c0_i32_1 = arith.constant 0 : i32
    return %c0_i32, %c0_i32_0 : i32, i32
  }
  func.func @transform_8(%arg0: i32) -> (i32, i32) {
    %c0_i32 = arith.constant 0 : i32
    %c0_i32_0 = arith.constant 0 : i32
    %c0_i32_1 = arith.constant 0 : i32
    return %c0_i32, %c0_i32_0 : i32, i32
  }
  func.func @transform_9(%arg0: i32) -> (i32, i32) {
    %c0_i32 = arith.constant 0 : i32
    %c0_i32_0 = arith.constant 0 : i32
    %c0_i32_1 = arith.constant 0 : i32
    return %c0_i32, %c0_i32_0 : i32, i32
  }
  func.func @transform_10(%arg0: i32) -> (i32, i32) {
    %c0_i32 = arith.constant 0 : i32
    %c0_i32_0 = arith.constant 0 : i32
    %c0_i32_1 = arith.constant 0 : i32
    return %c0_i32, %c0_i32_0 : i32, i32
  }
  func.func @transform_11(%arg0: i32) -> (i32, i32) {
    %c0_i32 = arith.constant 0 : i32
    %c0_i32_0 = arith.constant 0 : i32
    %c0_i32_1 = arith.constant 0 : i32
    return %c0_i32, %c0_i32_0 : i32, i32
  }
  func.func @transform_12(%arg0: i32) -> (i32, i32) {
    %c0_i32 = arith.constant 0 : i32
    %c0_i32_0 = arith.constant 0 : i32
    %c0_i32_1 = arith.constant 0 : i32
    return %c0_i32, %c0_i32_0 : i32, i32
  }
  func.func @transform_13(%arg0: i32) -> (i32, i32, i32) {
    %c0_i32 = arith.constant 0 : i32
    %c0_i32_0 = arith.constant 0 : i32
    %c0_i32_1 = arith.constant 0 : i32
    %c0_i32_2 = arith.constant 0 : i32
    return %c0_i32, %c0_i32_0, %c0_i32_1 : i32, i32, i32
  }
}

module attributes {stable_mosaic.version = 11 : i64} {
  func.func @_mean_decoder_kernel(%arg0: i32, %arg1: memref<2x8x32xf32, #tpu.memory_space<vmem>>, %arg2: memref<32x128xf32, #tpu.memory_space<vmem>>, %arg3: memref<1x128xf32, #tpu.memory_space<vmem>>, %arg4: memref<8x128xf32, #tpu.memory_space<vmem>>) attributes {dimension_semantics = [#tpu.dimension_semantics<arbitrary>], iteration_bounds = array<i64: 1>, scalar_prefetch = 0 : i64, scratch_operands = 0 : i64, tpu.core_type = #tpu.core_type<tc>, window_params = [{pipeline_mode = #tpu.pipeline_mode<synchronous>, transform_indices = @transform_0, window_bounds = array<i64: 2, 8, 32>}, {pipeline_mode = #tpu.pipeline_mode<synchronous>, transform_indices = @transform_1, window_bounds = array<i64: 32, 128>}, {pipeline_mode = #tpu.pipeline_mode<synchronous>, transform_indices = @transform_2, window_bounds = array<i64: 1, 128>}, {pipeline_mode = #tpu.pipeline_mode<synchronous>, transform_indices = @transform_3, window_bounds = array<i64: 8, 128>}]} {
    %c0 = arith.constant 0 : index
    %c0_0 = arith.constant 0 : index
    %c0_1 = arith.constant 0 : index
    %0 = vector.load %arg1[%c0, %c0_0, %c0_1] : memref<2x8x32xf32, #tpu.memory_space<vmem>>, vector<2x8x32xf32>
    %cst = arith.constant dense<0.000000e+00> : vector<8x32xf32>
    %1 = vector.multi_reduction <add>, %0, %cst [0] : vector<2x8x32xf32> to vector<8x32xf32>
    %cst_2 = arith.constant 5.000000e-01 : f32
    %2 = vector.broadcast %cst_2 : f32 to vector<8x32xf32>
    %3 = arith.mulf %1, %2 : vector<8x32xf32>
    %c0_3 = arith.constant 0 : index
    %c0_4 = arith.constant 0 : index
    %4 = vector.load %arg2[%c0_3, %c0_4] : memref<32x128xf32, #tpu.memory_space<vmem>>, vector<32x128xf32>
    %cst_5 = arith.constant dense<0.000000e+00> : vector<8x128xf32>
    %5 = tpu.matmul %3, %4, %cst_5 {dimension_numbers = #tpu.dot_dimension_numbers<[1], [0], [0], [1], [0, 0, 1, 1], [], []>} : vector<8x32xf32>, vector<32x128xf32>, vector<8x128xf32> -> vector<8x128xf32>
    %c0_6 = arith.constant 0 : index
    %c0_7 = arith.constant 0 : index
    %6 = vector.load %arg3[%c0_6, %c0_7] : memref<1x128xf32, #tpu.memory_space<vmem>>, vector<1x128xf32>
    %7 = vector.broadcast %6 : vector<1x128xf32> to vector<8x128xf32>
    %8 = arith.addf %5, %7 : vector<8x128xf32>
    %c0_8 = arith.constant 0 : index
    %c0_9 = arith.constant 0 : index
    %9 = vector.load %arg4[%c0_8, %c0_9] : memref<8x128xf32, #tpu.memory_space<vmem>>, vector<8x128xf32>
    tpu.vector_store %arg4[%c0_8, %c0_9], %8 {strides = array<i32>} : memref<8x128xf32, #tpu.memory_space<vmem>>, vector<8x128xf32>,
    return
  }
  func.func @transform_0(%arg0: i32) -> (i32, i32, i32) {
    %c0_i32 = arith.constant 0 : i32
    %c0_i32_0 = arith.constant 0 : i32
    %c0_i32_1 = arith.constant 0 : i32
    %c0_i32_2 = arith.constant 0 : i32
    return %c0_i32, %c0_i32_0, %c0_i32_1 : i32, i32, i32
  }
  func.func @transform_1(%arg0: i32) -> (i32, i32) {
    %c0_i32 = arith.constant 0 : i32
    %c0_i32_0 = arith.constant 0 : i32
    %c0_i32_1 = arith.constant 0 : i32
    return %c0_i32, %c0_i32_0 : i32, i32
  }
  func.func @transform_2(%arg0: i32) -> (i32, i32) {
    %c0_i32 = arith.constant 0 : i32
    %c0_i32_0 = arith.constant 0 : i32
    %c0_i32_1 = arith.constant 0 : i32
    return %c0_i32, %c0_i32_0 : i32, i32
  }
  func.func @transform_3(%arg0: i32) -> (i32, i32) {
    %c0_i32 = arith.constant 0 : i32
    %c0_i32_0 = arith.constant 0 : i32
    %c0_i32_1 = arith.constant 0 : i32
    return %c0_i32, %c0_i32_0 : i32, i32
  }
}

module attributes {stable_mosaic.version = 11 : i64} {
  func.func @_embed_pe_kernel(%arg0: i32, %arg1: memref<2x8x16xf32, #tpu.memory_space<vmem>>, %arg2: memref<16x32xf32, #tpu.memory_space<vmem>>, %arg3: memref<1x32xf32, #tpu.memory_space<vmem>>, %arg4: memref<8x32xf32, #tpu.memory_space<vmem>>, %arg5: memref<2x8x32xf32, #tpu.memory_space<vmem>>) attributes {dimension_semantics = [#tpu.dimension_semantics<arbitrary>], iteration_bounds = array<i64: 1>, scalar_prefetch = 0 : i64, scratch_operands = 0 : i64, tpu.core_type = #tpu.core_type<tc>, window_params = [{pipeline_mode = #tpu.pipeline_mode<synchronous>, transform_indices = @transform_0, window_bounds = array<i64: 2, 8, 16>}, {pipeline_mode = #tpu.pipeline_mode<synchronous>, transform_indices = @transform_1, window_bounds = array<i64: 16, 32>}, {pipeline_mode = #tpu.pipeline_mode<synchronous>, transform_indices = @transform_2, window_bounds = array<i64: 1, 32>}, {pipeline_mode = #tpu.pipeline_mode<synchronous>, transform_indices = @transform_3, window_bounds = array<i64: 8, 32>}, {pipeline_mode = #tpu.pipeline_mode<synchronous>, transform_indices = @transform_4, window_bounds = array<i64: 2, 8, 32>}]} {
    %c0 = arith.constant 0 : index
    %c0_0 = arith.constant 0 : index
    %c0_1 = arith.constant 0 : index
    %0 = vector.load %arg1[%c0, %c0_0, %c0_1] : memref<2x8x16xf32, #tpu.memory_space<vmem>>, vector<2x8x16xf32>
    %1 = vector.shape_cast %0 : vector<2x8x16xf32> to vector<16x16xf32>
    %c0_2 = arith.constant 0 : index
    %c0_3 = arith.constant 0 : index
    %2 = vector.load %arg2[%c0_2, %c0_3] : memref<16x32xf32, #tpu.memory_space<vmem>>, vector<16x32xf32>
    %cst = arith.constant dense<0.000000e+00> : vector<16x32xf32>
    %3 = tpu.matmul %1, %2, %cst {dimension_numbers = #tpu.dot_dimension_numbers<[1], [0], [0], [1], [0, 0, 1, 1], [], []>} : vector<16x16xf32>, vector<16x32xf32>, vector<16x32xf32> -> vector<16x32xf32>
    %c0_4 = arith.constant 0 : index
    %c0_5 = arith.constant 0 : index
    %4 = vector.load %arg3[%c0_4, %c0_5] : memref<1x32xf32, #tpu.memory_space<vmem>>, vector<1x32xf32>
    %5 = vector.broadcast %4 : vector<1x32xf32> to vector<16x32xf32>
    %6 = arith.addf %3, %5 : vector<16x32xf32>
    %cst_6 = arith.constant 1.41421354 : f32
    %7 = vector.broadcast %cst_6 : f32 to vector<16x32xf32>
    %8 = arith.mulf %6, %7 : vector<16x32xf32>
    %9 = vector.shape_cast %8 : vector<16x32xf32> to vector<2x8x32xf32>
    %c0_7 = arith.constant 0 : index
    %c0_8 = arith.constant 0 : index
    %10 = vector.load %arg4[%c0_7, %c0_8] : memref<8x32xf32, #tpu.memory_space<vmem>>, vector<8x32xf32>
    %11 = vector.shape_cast %10 : vector<8x32xf32> to vector<1x8x32xf32>
    %12 = vector.broadcast %11 : vector<1x8x32xf32> to vector<2x8x32xf32>
    %13 = arith.addf %9, %12 : vector<2x8x32xf32>
    %c0_9 = arith.constant 0 : index
    %c0_10 = arith.constant 0 : index
    %c0_11 = arith.constant 0 : index
    %14 = vector.load %arg5[%c0_9, %c0_10, %c0_11] : memref<2x8x32xf32, #tpu.memory_space<vmem>>, vector<2x8x32xf32>
    tpu.vector_store %arg5[%c0_9, %c0_10, %c0_11], %13 {strides = array<i32>} : memref<2x8x32xf32, #tpu.memory_space<vmem>>, vector<2x8x32xf32>,
    return
  }
  func.func @transform_0(%arg0: i32) -> (i32, i32, i32) {
    %c0_i32 = arith.constant 0 : i32
    %c0_i32_0 = arith.constant 0 : i32
    %c0_i32_1 = arith.constant 0 : i32
    %c0_i32_2 = arith.constant 0 : i32
    return %c0_i32, %c0_i32_0, %c0_i32_1 : i32, i32, i32
  }
  func.func @transform_1(%arg0: i32) -> (i32, i32) {
    %c0_i32 = arith.constant 0 : i32
    %c0_i32_0 = arith.constant 0 : i32
    %c0_i32_1 = arith.constant 0 : i32
    return %c0_i32, %c0_i32_0 : i32, i32
  }
  func.func @transform_2(%arg0: i32) -> (i32, i32) {
    %c0_i32 = arith.constant 0 : i32
    %c0_i32_0 = arith.constant 0 : i32
    %c0_i32_1 = arith.constant 0 : i32
    return %c0_i32, %c0_i32_0 : i32, i32
  }
  func.func @transform_3(%arg0: i32) -> (i32, i32) {
    %c0_i32 = arith.constant 0 : i32
    %c0_i32_0 = arith.constant 0 : i32
    %c0_i32_1 = arith.constant 0 : i32
    return %c0_i32, %c0_i32_0 : i32, i32
  }
  func.func @transform_4(%arg0: i32) -> (i32, i32, i32) {
    %c0_i32 = arith.constant 0 : i32
    %c0_i32_0 = arith.constant 0 : i32
    %c0_i32_1 = arith.constant 0 : i32
    %c0_i32_2 = arith.constant 0 : i32
    return %c0_i32, %c0_i32_0, %c0_i32_1 : i32, i32, i32
  }
}

</mosaic_0001>

<bundles_post_ra>
// kernel: transformer_forward.7
= control target key start
LH: loop header
LB: loop body
LE: loop exit
PB: predicated region body
PF: predicated region fallthrough
CT: control target
= control target key end

     0   :  { %v173_v3 = vmov 0.0|0.0   ;;  %vm174_vm0 = vmmov 0   ;;  %v175_v6 = vmov 0.0   ;;  %vm17_vm1 = vcmask 261120   ;;  %s230_s0 = inlined_call_operand.vmem [shape: f32[2,8,32], index: 0, kind: input, shape index: {}]   ;;  %s231_s1 = inlined_call_operand.vmem [shape: f32[32,128], index: 1, kind: input, shape index: {}]   ;;  %s232_s2 = inlined_call_operand.vmem [shape: f32[1,128], index: 2, kind: input, shape index: {}]   ;;  %s233_s3 = inlined_call_operand.hbm [shape: f32[8,128], index: 3, kind: output, shape index: {}]  }
   0x1   :  { %v22_v0 = vld [vmem:[%s231_s1] sm:$0xff]  ;;  %v23_v1 = vld [vmem:[%s231_s1 + $0x8] sm:$0xff]  ;;  %v24_v2 = vld [vmem:[%s231_s1 + $0x10] sm:$0xff]  ;;  %139 = vmatprep.subr.bf16.mxu0 %v173_v3  ;;  %136 = vmatprep.mubr.msk.f32.mxu0 %vm174_vm0, %v175_v6 }
   0x2   :  { %v140_v4 = vpack.c.bf16 %v23_v1, %v22_v0  ;;  %v25_v5 = vld [vmem:[%s231_s1 + $0x18] sm:$0xff]  ;;  %v15_v7 = vld [vmem:[%s230_s0] sm:$0xff]  ;;  %v16_v8 = vld [vmem:[%s230_s0 + $0x8] sm:$0xff] }
   0x3   :  { %v18_v9 = vsel %vm17_vm1, %v15_v7, 0.0  ;;  %v19_v10 = vsel %vm17_vm1, %v16_v8, 0.0 }
   0x4   :  { %8 = vsyncpa [#allocation3], 0  ;;  %141 = vmatpush3.bf16.msra.mxu0 %v140_v4  ;;  %v143_v11 = vpack.c.bf16 %v25_v5, %v24_v2  ;;  %v20_v12 = vadd.f32 %v19_v10, %v18_v9  ;;  %v121_v14 = vld [vmem:[%s232_s2] ss:$0 sm:$0xff]  ;;  %s176_s25 = smov [#allocation2]  }
   0x5   :  { %142 = vmatprep.subr.bf16.mxu0 %v173_v3  ;;  %s113_s26 = sshll.u32 %s176_s25, 4  ;;  %s114_s26 = int_to_ptr.vmem [resolvable:$true] %s113_s26 }
   0x6   :  { %v21_v13 = vmul.f32 0.5, %v20_v12  ;;  %s149_s0 = scalar_lea.vmem %s114_s26, 128  ;;  %p154_p1 = scmp.lt.s32.totalorder %s114_s26, %s114_s26 }
   0x7   :  { %p150_p0 = scmp.ne.s32.totalorder %s114_s26, %s149_s0  ;;  %p155_p2 = scmp.lt.s32.totalorder %s149_s0, %s149_s0 }
   0x8   :  { %144 = vmatpush3.bf16.msra.mxu0 %v143_v11 }
   0x9   :  { %p156_p3 = por %p155_p2, %p154_p1 }
   0xb   :  { %137 = vmatmul.mubr.msk.f32.vlgmr.msra.gmra.mrb[0].mxu0 %vm17_vm1, %v21_v13  ;;  %p157_p4 = pnand %p156_p3, %p150_p0 }
  0xde   :  { %v102_v15 = vpop.f32.mrb[0].mxu0 }
  0xdf   :  { %v103_v16 = vadd.f32 %v121_v14, %v102_v15  ;;  %v138_v17 = vpop.f32.mrb[1].mxu0 }
  0xe1   :  { %106 = vst [vmem:[#allocation2] sm:$0xff] %v103_v16 }
  0xe2   :  { %160 = shalt.err (!%p157_p4)
}
  0xe3   :  { %s161_s29 = scalar_lea.hbm %s233_s3, 128 }
  0xe4   :  { %p162_p5 = scmp.ne.s32.totalorder %s233_s3, %s161_s29  ;;  %p165_p6 = scmp.lt.u32.totalorder %s161_s29, %s233_s3 }
  0xe6   :  { %p167_p7 = pnand %p165_p6, %p162_p5 }
  0xe8   :  { %170 = shalt.err (!%p167_p7)
}
  0xe9   :  { %116 = dma.vmem_to_hbm [thread:$0]  %s114_s26, 128, %s233_s3, [#allocation3]  }
  0xea   :  { %171 = dma.done.wait [#allocation3], 128  }
  0xeb   :  { %172 = vsyncadd [#allocation3], 4294967168 }
  0xec   :  { %120 = vsyncpa [#allocation3], 1 }

// kernel: transformer_forward.4
= control target key start
LH: loop header
LB: loop body
LE: loop exit
PB: predicated region body
PF: predicated region fallthrough
CT: control target
= control target key end

     0   :  { %vm28_vm0 = vcmask 130048   ;;  %vm115_vm1 = vcmask 261120   ;;  %s189_s1 = inlined_call_operand.vmem [shape: f32[16,32], index: 1, kind: input, shape index: {}]   ;;  %s190_s0 = inlined_call_operand.vmem [shape: f32[2,8,16], index: 0, kind: input, shape index: {}]   ;;  %s191_s2 = inlined_call_operand.vmem [shape: f32[1,32], index: 2, kind: input, shape index: {}]   ;;  %s192_s3 = inlined_call_operand.vmem [shape: f32[8,32], index: 3, kind: input, shape index: {}]   ;;  %s193_s4 = inlined_call_operand.vmem [shape: f32[2,8,32], index: 4, kind: output, shape index: {}]  }
   0x1   :  { %v19_v0 = vld [vmem:[%s189_s1] sm:$0xff]  ;;  %v20_v1 = vld [vmem:[%s189_s1 + $0x8] sm:$0xff] }
   0x2   :  { %v17_v2 = vld [vmem:[%s190_s0] sm:$0xff]  ;;  %v136_v3 = vpack.c.bf16 %v20_v1, %v19_v0  ;;  %v18_v4 = vld [vmem:[%s190_s0 + $0x8] sm:$0xff] }
   0x3   :  { %133 = vmatprep.mubr.msk.f32.mxu0 %vm28_vm0, %v17_v2  ;;  %v122_v5 = vld [vmem:[%s191_s2] ss:$0 sm:$0xff] }
   0x4   :  { %137 = vmatprep.subr.bf16.mxu0 %v136_v3  ;;  %v112_v9 = vld [vmem:[%s192_s3] sm:$0xff] }
   0x5   :  { %139 = vmatpush3.bf16.msra.mxu0 %v136_v3 }
   0x8   :  { %134 = vmatmul.mubr.msk.f32.vlgmr.msra.gmra.mrb[0].mxu0 %vm28_vm0, %v18_v4 }
  0xdb   :  { %v135_v6 = vpop.f32.mrb[0].mxu0 }
  0xdc   :  { %v107_v7 = vadd.f32 %v135_v6, %v122_v5  ;;  %v101_v8 = vpop.f32.mrb[1].mxu0 }
  0xdd   :  { %v102_v10 = vadd.f32 %v122_v5, %v101_v8 }
  0xde   :  { %v111_v11 = vmul.f32 1.4142135, %v107_v7 }
  0xdf   :  { %v110_v12 = vmul.f32 1.4142135, %v102_v10 }
  0xe0   :  { %v114_v13 = vadd.f32 %v112_v9, %v111_v11 }
  0xe1   :  { %v113_v14 = vadd.f32 %v112_v9, %v110_v12 }
  0xe2   :  { %117 = vst.msk [vmem:[%s193_s4 + $0x8] sm:$0xff] %vm115_vm1, %v114_v13 }
  0xe3   :  { %116 = vst.msk [vmem:[%s193_s4] sm:$0xff] %vm115_vm1, %v113_v14 }

// kernel: transformer_forward.5
= control target key start
LH: loop header
LB: loop body
LE: loop exit
PB: predicated region body
PF: predicated region fallthrough
CT: control target
= control target key end

     0   :  { %vm57_vm0 = vcmask 261120   ;;  %v2480_v8 = vmov 0.0   ;;  %vm2481_vm1 = vmmov 0   ;;  %vm146_vm2 = vcmask 64512   ;;  %s2484_s21 = smov 88   ;;  %s2485_s22 = smov 120   ;;  %s2851_s1 = inlined_call_operand.vmem [shape: f32[32,96], index: 1, kind: input, shape index: {}]   ;;  %s2852_s0 = inlined_call_operand.vmem [shape: f32[2,8,32], index: 0, kind: input, shape index: {}]   ;;  %s2853_s2 = inlined_call_operand.vmem [shape: f32[1,96], index: 2, kind: input, shape index: {}]   ;;  %s2854_s3 = inlined_call_operand.vmem [shape: f32[32,32], index: 3, kind: input, shape index: {}]   ;;  %s2855_s4 = inlined_call_operand.vmem [shape: f32[1,32], index: 4, kind: input, shape index: {}]   ;;  %s2856_s7 = inlined_call_operand.vmem [shape: f32[32,128], index: 7, kind: input, shape index: {}]   ;;  %s2857_s9 = inlined_call_operand.vmem [shape: f32[128,32], index: 9, kind: input, shape index: {}]   ;;  %s2858_s5 = inlined_call_operand.vmem [shape: f32[1,32], index: 5, kind: input, shape index: {}]   ;;  %s2859_s6 = inlined_call_operand.vmem [shape: f32[1,32], index: 6, kind: input, shape index: {}]   ;;  %s2860_s8 = inlined_call_operand.vmem [shape: f32[1,128], index: 8, kind: input, shape index: {}]   ;;  %s2861_s10 = inlined_call_operand.vmem [shape: f32[1,32], index: 10, kind: input, shape index: {}]   ;;  %s2862_s11 = inlined_call_operand.vmem [shape: f32[1,32], index: 11, kind: input, shape index: {}]   ;;  %s2863_s12 = inlined_call_operand.vmem [shape: f32[1,32], index: 12, kind: input, shape index: {}]   ;;  %s2864_s13 = inlined_call_operand.vmem [shape: f32[2,8,32], index: 13, kind: output, shape index: {}]  }
   0x1   :  { %v46_v0 = vld [vmem:[%s2851_s1] sm:$0xff]  ;;  %v47_v1 = vld [vmem:[%s2851_s1 + $0x8] sm:$0xff]  ;;  %v48_v2 = vld [vmem:[%s2851_s1 + $0x10] sm:$0xff]  ;;  %2257 = vmatprep.subr.mxu0 %v2480_v8  ;;  %2259 = vmatprep.mubr.msk.f32.mxu0 %vm2481_vm1, %v2480_v8  ;;  %s2486_s23 = smov 56   ;;  %s2487_s24 = smov 112  }
   0x2   :  { %v2373_v3 = vpack.c.bf16 %v47_v1, %v46_v0  ;;  %v49_v4 = vld [vmem:[%s2851_s1 + $0x18] sm:$0xff]  ;;  %v2578_v5 = vld [vmem:[%s2852_s0] sm:$0xff]  ;;  %v2585_v7 = vld [vmem:[%s2852_s0 + $0x8] sm:$0xff]  ;;  %s2482_s0 = smov 96   ;;  %s2488_s25 = smov 80  }
   0x3   :  { %v2377_v6 = vpack.c.bf16 %v49_v4, %v48_v2  ;;  %2224 = vmatprep.mubr.msk.f32.mxu1 %vm57_vm0, %v2578_v5  ;;  %v2098_v9 = vld [vmem:[%s2853_s2] ss:$0 sm:$0xff]  ;;  %s2483_s2 = smov 64   ;;  %s2489_s26 = smov 48  }
   0x4   :  { %2374 = vmatprep.subr.bf16.mxu1 %v2373_v3  ;;  %s2490_s27 = smov 72   ;;  %s2491_s28 = smov 104  }
   0x5   :  { %2376 = vmatpush3.bf16.msra.mxu1 %v2373_v3  ;;  %s2492_s18 = smov 40  }
   0x6   :  { %2378 = vmatprep.subr.bf16.mxu1 %v2377_v6 }
   0x9   :  { %2380 = vmatpush3.bf16.msra.mxu1 %v2377_v6 }
   0xa   :  { %2227 = vmatprep.subr.mxu1 %v2480_v8 }
   0xc   :  { %2225 = vmatmul.mubr.msk.f32.vlgmr.msra.gmra.mrb[0].mxu1 %vm57_vm0, %v2585_v7 }
   0xd   :  { %2229 = vmatprep.mubr.msk.f32.mxu1 %vm2481_vm1, %v2480_v8 }
  0xdf   :  { %v2226_v10 = vpop.f32.mrb[0].mxu1 }
  0xe0   :  { %v130_v11 = vpop.f32.mrb[1].mxu1  ;;  %v2601_v13 = vadd.f32 %v2226_v10, %v2098_v9 }
  0xe1   :  { %v2598_v12 = vadd.f32 %v2098_v9, %v130_v11 }
  0xe3   :  { %144 = vrot.lane.b32.xlu0 %v2598_v12, %s2482_s0 }
  0xe7   :  { %222 = vrot.lane.b32.xlu0 %v2601_v13, %s2482_s0 }
 0x155   :  { %v145_v14 = vpop.permute.xlu0 %144 }
 0x156   :  { %2228 = vmatpush3.xpose.msk.msra.mxu1 %vm146_vm2, %v145_v14 }
 0x157   :  { %2232 = vmatprep.subr.mxu1 %v2480_v8 }
 0x159   :  { %2230 = vmatmul.mubr.msk.f32.vlgmr.msra.gmra.mrb[2].mxu1 %vm146_vm2, %v2598_v12  ;;  %v223_v15 = vpop.permute.xlu0 %222 }
 0x15a   :  { %2233 = vmatpush3.xpose.msk.msra.mxu1 %vm146_vm2, %v223_v15  ;;  %2234 = vmatprep.mubr.msk.f32.mxu1 %vm2481_vm1, %v2480_v8 }
 0x15b   :  { %2237 = vmatprep.subr.mxu1 %v2480_v8 }
 0x15d   :  { %2235 = vmatmul.mubr.msk.f32.vlgmr.msra.gmra.mrb[4].mxu1 %vm146_vm2, %v2601_v13 }
 0x15e   :  { %2239 = vmatprep.mubr.msk.f32.mxu1 %vm2481_vm1, %v2480_v8 }
 0x22c   :  { %v217_v16 = vpop.f32.mrb[2].mxu1 }
 0x22d   :  { %v298_v17 = vmul.f32 0.35355338, %v217_v16  ;;  %v2231_v18 = vpop.f32.mrb[3].mxu1 }
 0x22f   :  { %v300_v19 = vsel %vm146_vm2, %v298_v17, -inf }
 0x230   :  { %301 = vmax.xlane.f32.xlu1 %v300_v19  ;;  %v294_v20 = vpop.f32.mrb[4].mxu1 }
 0x231   :  { %v299_v21 = vmul.f32 0.35355338, %v294_v20  ;;  %v2236_v22 = vpop.f32.mrb[5].mxu1 }
 0x232   :  { %v140_v22 = vld [vmem:[%s2854_s3 + $0x8] sm:$0xff] }
 0x233   :  { %v303_v23 = vsel %vm146_vm2, %v299_v21, -inf }
 0x234   :  { %304 = vmax.xlane.f32.xlu1 %v303_v23  ;;  %v139_v23 = vld [vmem:[%s2854_s3] sm:$0xff] }
 0x245   :  { %322 = vrot.lane.b32.xlu1 %v2598_v12, %s2483_s2 }
 0x249   :  { %398 = vrot.lane.b32.xlu1 %v2601_v13, %s2483_s2 }
 0x24d   :  { %476 = vrot.lane.b32.xlu1 %v2598_v12, %s2484_s21 }
 0x251   :  { %474 = vrot.lane.b32.xlu1 %v2598_v12, %s2485_s22 }
 0x2bd   :  { %v302_v24 = vpop.xlane.xlu1 %301 }
 0x2be   :  { %v306_v25 = vsub.f32 %v298_v17, %v302_v24 }
 0x2c0   :  { %v308_v26 = vmul.f32 1.442695, %v306_v25 }
 0x2c1   :  { %v305_v27 = vpop.xlane.xlu1 %304 }
 0x2c2   :  { %2440 = vpow2.f32 %v308_v26  ;;  %v307_v28 = vsub.f32 %v299_v21, %v305_v27 }
 0x2c4   :  { %v310_v29 = vmul.f32 1.442695, %v307_v28 }
 0x2c5   :  { %v323_v30 = vpop.permute.xlu1 %322 }
 0x2c6   :  { %2442 = vpow2.f32 %v310_v29  ;;  %2238 = vmatpush3.msra.mxu1 %v323_v30 }
 0x2c7   :  { %2242 = vmatprep.subr.mxu1 %v2480_v8 }
 0x2c9   :  { %v399_v35 = vpop.permute.xlu1 %398 }
 0x2cc   :  { %v2441_v31 = vpop.eup %2440 }
 0x2cd   :  { %v312_v32 = vsel %vm146_vm2, %v2441_v31, 0.0  ;;  %v477_v36 = vpop.permute.xlu1 %476 }
 0x2ce   :  { %313 = vadd.xlane.f32.xlu0 %v312_v32 }
 0x2d0   :  { %v2443_v33 = vpop.eup %2442 }
 0x2d1   :  { %v315_v34 = vsel %vm146_vm2, %v2443_v33, 0.0  ;;  %v475_v37 = vpop.permute.xlu1 %474 }
 0x2d2   :  { %316 = vadd.xlane.f32.xlu1 %v315_v34 }
 0x2e3   :  { %552 = vrot.lane.b32.xlu1 %v2601_v13, %s2485_s22 }
 0x2e4   :  { %554 = vrot.lane.b32.xlu0 %v2601_v13, %s2484_s21 }
 0x35b   :  { %v314_v38 = vpop.xlane.xlu0 %313 }
 0x35c   :  { %2444 = vrcp.f32 %v314_v38 }
 0x35f   :  { %v317_v39 = vpop.xlane.xlu1 %316  ;;  %v555_v44 = vpop.permute.xlu0 %554 }
 0x360   :  { %2446 = vrcp.f32 %v317_v39 }
 0x363   :  { %v553_v45 = vpop.permute.xlu1 %552 }
 0x366   :  { %v2445_v40 = vpop.eup %2444 }
 0x367   :  { %v319_v41 = vmul.f32 %v2445_v40, %v2441_v31 }
 0x369   :  { %2240 = vmatmul.mubr.msk.f32.vlgmr.msra.gmra.mrb[6].mxu1 %vm146_vm2, %v319_v41 }
 0x36a   :  { %v2447_v42 = vpop.eup %2446  ;;  %2243 = vmatpush3.msra.mxu1 %v399_v35  ;;  %2244 = vmatprep.mubr.msk.f32.mxu1 %vm2481_vm1, %v2480_v8 }
 0x36b   :  { %v321_v43 = vmul.f32 %v2447_v42, %v2443_v33  ;;  %2247 = vmatprep.subr.mxu1 %v2480_v8 }
 0x36d   :  { %2245 = vmatmul.mubr.msk.f32.vlgmr.msra.gmra.mrb[8].mxu1 %vm146_vm2, %v321_v43 }
 0x36e   :  { %2249 = vmatprep.mubr.msk.f32.mxu1 %vm2481_vm1, %v2480_v8 }
 0x371   :  { %2248 = vmatpush3.xpose.msk.msra.mxu1 %vm146_vm2, %v477_v36 }
 0x372   :  { %2252 = vmatprep.subr.mxu1 %v2480_v8 }
 0x374   :  { %2250 = vmatmul.mubr.msk.f32.vlgmr.msra.gmra.mrb[10].mxu1 %vm146_vm2, %v475_v37 }
 0x375   :  { %2253 = vmatpush3.xpose.msk.msra.mxu1 %vm146_vm2, %v555_v44  ;;  %2254 = vmatprep.mubr.msk.f32.mxu1 %vm2481_vm1, %v2480_v8 }
 0x376   :  { %2262 = vmatprep.subr.mxu1 %v2480_v8 }
 0x378   :  { %2255 = vmatmul.mubr.msk.f32.vlgmr.msra.gmra.mrb[12].mxu1 %vm146_vm2, %v553_v45 }
 0x379   :  { %2264 = vmatprep.mubr.msk.f32.mxu1 %vm2481_vm1, %v2480_v8 }
 0x43c   :  { %v2644_v46 = vpop.f32.mrb[6].mxu1 }
 0x43d   :  { %v2241_v47 = vpop.f32.mrb[7].mxu1 }
 0x440   :  { %v2646_v48 = vpop.f32.mrb[8].mxu1 }
 0x441   :  { %v2246_v49 = vpop.f32.mrb[9].mxu1 }
 0x447   :  { %v548_v50 = vpop.f32.mrb[10].mxu1 }
 0x448   :  { %v2251_v51 = vpop.f32.mrb[11].mxu1  ;;  %v630_v56 = vmul.f32 0.35355338, %v548_v50 }
 0x44a   :  { %v632_v57 = vsel %vm146_vm2, %v630_v56, -inf }
 0x44b   :  { %v626_v52 = vpop.f32.mrb[12].mxu1 }
 0x44c   :  { %v631_v53 = vmul.f32 0.35355338, %v626_v52  ;;  %v2256_v54 = vpop.f32.mrb[13].mxu1 }
 0x44e   :  { %v635_v55 = vsel %vm146_vm2, %v631_v53, -inf }
 0x44f   :  { %636 = vmax.xlane.f32.xlu1 %v635_v55 }
 0x460   :  { %730 = vrot.lane.b32.xlu1 %v2601_v13, %s2486_s23 }
 0x464   :  { %968 = vrot.lane.b32.xlu1 %v2598_v12, %s2487_s24 }
 0x468   :  { %1048 = vrot.lane.b32.xlu1 %v2601_v13, %s2488_s25 }
 0x46c   :  { %1046 = vrot.lane.b32.xlu1 %v2601_v13, %s2487_s24 }
 0x490   :  { %633 = vmax.xlane.f32.xlu1 %v632_v57 }
 0x4dc   :  { %v637_v58 = vpop.xlane.xlu1 %636 }
 0x4dd   :  { %v639_v59 = vsub.f32 %v631_v53, %v637_v58 }
 0x4df   :  { %v642_v60 = vmul.f32 1.442695, %v639_v59 }
 0x4e0   :  { %v731_v61 = vpop.permute.xlu1 %730 }
 0x4e1   :  { %2448 = vpow2.f32 %v642_v60  ;;  %2263 = vmatpush3.msra.mxu1 %v731_v61 }
 0x4e2   :  { %2277 = vmatprep.subr.mxu1 %v2480_v8 }
 0x4e4   :  { %v969_v0 = vpop.permute.xlu1 %968 }
 0x4e8   :  { %v1049_v1 = vpop.permute.xlu1 %1048 }
 0x4eb   :  { %v2449_v62 = vpop.eup %2448 }
 0x4ec   :  { %v647_v63 = vsel %vm146_vm2, %v2449_v62, 0.0  ;;  %v1047_v2 = vpop.permute.xlu1 %1046 }
 0x4ed   :  { %648 = vadd.xlane.f32.xlu0 %v647_v63 }
 0x503   :  { %970 = vrot.lane.b32.xlu0 %v2598_v12, %s2488_s25 }
 0x51d   :  { %v634_v3 = vpop.xlane.xlu1 %633 }
 0x51e   :  { %v638_v4 = vsub.f32 %v630_v56, %v634_v3 }
 0x520   :  { %v640_v6 = vmul.f32 1.442695, %v638_v4 }
 0x522   :  { %2450 = vpow2.f32 %v640_v6 }
 0x52c   :  { %v2451_v9 = vpop.eup %2450 }
 0x52d   :  { %v644_v10 = vsel %vm146_vm2, %v2451_v9, 0.0 }
 0x52e   :  { %645 = vadd.xlane.f32.xlu0 %v644_v10 }
 0x544   :  { %654 = vrot.lane.b32.xlu0 %v2598_v12, %s2486_s23 }
 0x548   :  { %1224 = vrot.lane.b32.xlu0 %v2601_v13, %s2489_s26 }
 0x54c   :  { %1385 = vrot.lane.b32.xlu0 %v2598_v12, %s2490_s27 }
 0x550   :  { %1463 = vrot.lane.b32.xlu0 %v2601_v13, %s2490_s27 }
 0x554   :  { %1383 = vrot.lane.b32.xlu0 %v2598_v12, %s2491_s28 }
 0x57a   :  { %v649_v11 = vpop.xlane.xlu0 %648 }
 0x57b   :  { %2452 = vrcp.f32 %v649_v11 }
 0x57e   :  { %v971_v16 = vpop.permute.xlu0 %970 }
 0x585   :  { %v2453_v14 = vpop.eup %2452 }
 0x586   :  { %v653_v15 = vmul.f32 %v2453_v14, %v2449_v62 }
 0x588   :  { %2265 = vmatmul.mubr.msk.f32.vlgmr.msra.gmra.mrb[14].mxu1 %vm146_vm2, %v653_v15 }
 0x589   :  { %2278 = vmatpush3.xpose.msk.msra.mxu1 %vm146_vm2, %v971_v16  ;;  %2279 = vmatprep.mubr.msk.f32.mxu1 %vm2481_vm1, %v2480_v8 }
 0x58a   :  { %2282 = vmatprep.subr.mxu1 %v2480_v8 }
 0x58c   :  { %2280 = vmatmul.mubr.msk.f32.vlgmr.msra.gmra.mrb[16].mxu1 %vm146_vm2, %v969_v0 }
 0x58d   :  { %2283 = vmatpush3.xpose.msk.msra.mxu1 %vm146_vm2, %v1049_v1  ;;  %2284 = vmatprep.mubr.msk.f32.mxu1 %vm2481_vm1, %v2480_v8 }
 0x58e   :  { %2292 = vmatprep.subr.mxu1 %v2480_v8 }
 0x590   :  { %2285 = vmatmul.mubr.msk.f32.vlgmr.msra.gmra.mrb[18].mxu1 %vm146_vm2, %v1047_v2 }
 0x591   :  { %2294 = vmatprep.mubr.msk.f32.mxu1 %vm2481_vm1, %v2480_v8 }
 0x5bb   :  { %v646_v17 = vpop.xlane.xlu0 %645 }
 0x5bc   :  { %2454 = vrcp.f32 %v646_v17 }
 0x5bf   :  { %v655_v18 = vpop.permute.xlu0 %654 }
 0x5c0   :  { %2258 = vmatpush3.msra.mxu0 %v655_v18 }
 0x5c1   :  { %2267 = vmatprep.subr.mxu0 %v140_v22 }
 0x5c3   :  { %v1225_v19 = vpop.permute.xlu0 %1224 }
 0x5c4   :  { %2293 = vmatpush3.msra.mxu1 %v1225_v19 }
 0x5c5   :  { %2302 = vmatprep.subr.mxu1 %v2480_v8 }
 0x5c6   :  { %v2455_v20 = vpop.eup %2454 }
 0x5c7   :  { %v651_v21 = vmul.f32 %v2455_v20, %v2451_v9  ;;  %v1386_v50 = vpop.permute.xlu0 %1385 }
 0x5c9   :  { %2260 = vmatmul.mubr.msk.f32.vlgmr.msra.gmra.mrb[0].mxu0 %vm146_vm2, %v651_v21 }
 0x5ca   :  { %2268 = vmatpush3.msra.mxu0 %v140_v22 }
 0x5cb   :  { %2272 = vmatprep.subr.mxu0 %v139_v23  ;;  %v1464_v54 = vpop.permute.xlu0 %1463 }
 0x5cf   :  { %v1384_v56 = vpop.permute.xlu0 %1383 }
 0x65b   :  { %v802_v24 = vpop.f32.mrb[14].mxu1 }
 0x65c   :  { %v2266_v25 = vpop.f32.mrb[15].mxu1 }
 0x65f   :  { %v1042_v26 = vpop.f32.mrb[16].mxu1 }
 0x660   :  { %v1124_v27 = vmul.f32 0.35355338, %v1042_v26  ;;  %v2281_v28 = vpop.f32.mrb[17].mxu1 }
 0x662   :  { %v1126_v29 = vsel %vm146_vm2, %v1124_v27, -inf }
 0x663   :  { %1127 = vmax.xlane.f32.xlu1 %v1126_v29  ;;  %v1120_v30 = vpop.f32.mrb[18].mxu1 }
 0x664   :  { %v1125_v31 = vmul.f32 0.35355338, %v1120_v30  ;;  %v2286_v32 = vpop.f32.mrb[19].mxu1 }
 0x666   :  { %v1129_v33 = vsel %vm146_vm2, %v1125_v31, -inf }
 0x667   :  { %1130 = vmax.xlane.f32.xlu1 %v1129_v33 }
 0x69c   :  { %v726_v34 = vpop.f32.mrb[0].mxu0 }
 0x69d   :  { %v2261_v35 = vpop.f32.mrb[1].mxu0  ;;  %2269 = vmatprep.mubr.msk.f32.mxu0 %vm146_vm2, %v726_v34 }
 0x69e   :  { %2270 = vmatmul.mubr.msk.f32.vlgmr.msra.gmra.mrb[2].mxu0 %vm146_vm2, %v802_v24 }
 0x69f   :  { %2274 = vmatprep.mubr.msk.f32.mxu0 %vm146_vm2, %v2644_v46  ;;  %2273 = vmatpush3.msra.mxu0 %v139_v23 }
 0x6a0   :  { %2287 = vmatprep.subr.mxu0 %v2480_v8 }
 0x6a6   :  { %2275 = vmatmul.mubr.msk.f32.vlgmr.msra.gmra.mrb[2].mxu0 %vm146_vm2, %v2646_v48  ;;  %v141_v48 = vld [vmem:[%s2854_s3 + $0x10] sm:$0xff] }
 0x6a7   :  { %2289 = vmatprep.mubr.msk.f32.mxu0 %vm2481_vm1, %v2480_v8 }
 0x6f0   :  { %v1128_v36 = vpop.xlane.xlu1 %1127 }
 0x6f1   :  { %v1132_v37 = vsub.f32 %v1124_v27, %v1128_v36 }
 0x6f3   :  { %v1134_v38 = vmul.f32 1.442695, %v1132_v37 }
 0x6f4   :  { %v1131_v39 = vpop.xlane.xlu1 %1130 }
 0x6f5   :  { %2456 = vpow2.f32 %v1134_v38  ;;  %v1133_v40 = vsub.f32 %v1125_v31, %v1131_v39  ;;  %v2133_v31 = vld [vmem:[%s2855_s4] ss:$0 sm:$0xff] }
 0x6f7   :  { %v1136_v41 = vmul.f32 1.442695, %v1133_v40 }
 0x6f9   :  { %2458 = vpow2.f32 %v1136_v41 }
 0x6ff   :  { %v2457_v42 = vpop.eup %2456 }
 0x700   :  { %v1138_v43 = vsel %vm146_vm2, %v2457_v42, 0.0 }
 0x701   :  { %1139 = vadd.xlane.f32.xlu1 %v1138_v43 }
 0x703   :  { %v2459_v44 = vpop.eup %2458 }
 0x704   :  { %v1141_v45 = vsel %vm146_vm2, %v2459_v44, 0.0 }
 0x705   :  { %1142 = vadd.xlane.f32.xlu1 %v1141_v45 }
 0x716   :  { %1148 = vrot.lane.b32.xlu1 %v2598_v12, %s2489_s26 }
 0x71a   :  { %1461 = vrot.lane.b32.xlu1 %v2601_v13, %s2491_s28 }
 0x78e   :  { %v1140_v46 = vpop.xlane.xlu1 %1139 }
 0x78f   :  { %2460 = vrcp.f32 %v1140_v46 }
 0x792   :  { %v1143_v47 = vpop.xlane.xlu1 %1142 }
 0x793   :  { %2462 = vrcp.f32 %v1143_v47 }
 0x796   :  { %v1149_v49 = vpop.permute.xlu1 %1148 }
 0x797   :  { %2288 = vmatpush3.msra.mxu0 %v1149_v49  ;;  %v1855_v49 = vld [vmem:[%s2856_s7 + $0x8] sm:$0xff] }
 0x798   :  { %2297 = vmatprep.subr.mxu0 %v141_v48 }
 0x799   :  { %v2461_v51 = vpop.eup %2460 }
 0x79a   :  { %v1145_v52 = vmul.f32 %v2461_v51, %v2457_v42  ;;  %v1462_v61 = vpop.permute.xlu1 %1461  ;;  %v1856_v51 = vld [vmem:[%s2856_s7 + $0x10] sm:$0xff] }
 0x79c   :  { %2290 = vmatmul.mubr.msk.f32.vlgmr.msra.gmra.mrb[4].mxu0 %vm146_vm2, %v1145_v52  ;;  %v1857_v52 = vld [vmem:[%s2856_s7 + $0x18] sm:$0xff] }
 0x79d   :  { %v2463_v53 = vpop.eup %2462  ;;  %2298 = vmatpush3.msra.mxu0 %v141_v48  ;;  %v1854_v48 = vld [vmem:[%s2856_s7] sm:$0xff] }
 0x79e   :  { %v1147_v55 = vmul.f32 %v2463_v53, %v2459_v44  ;;  %2307 = vmatprep.subr.mxu0 %v2480_v8  ;;  %v2385_v53 = vpack.c.bf16 %v1857_v52, %v1856_v51 }
 0x7a0   :  { %2295 = vmatmul.mubr.msk.f32.vlgmr.msra.gmra.mrb[20].mxu1 %vm146_vm2, %v1147_v55  ;;  %v1949_v55 = vld [vmem:[%s2857_s9 + $0x8] sm:$0xff] }
 0x7a1   :  { %2303 = vmatpush3.xpose.msk.msra.mxu1 %vm146_vm2, %v1386_v50  ;;  %2304 = vmatprep.mubr.msk.f32.mxu1 %vm2481_vm1, %v2480_v8  ;;  %v2381_v50 = vpack.c.bf16 %v1855_v49, %v1854_v48 }
 0x7a2   :  { %2312 = vmatprep.subr.mxu1 %v2480_v8 }
 0x7a4   :  { %2305 = vmatmul.mubr.msk.f32.vlgmr.msra.gmra.mrb[22].mxu1 %vm146_vm2, %v1384_v56  ;;  %v1950_v56 = vld [vmem:[%s2857_s9 + $0x10] sm:$0xff] }
 0x7a5   :  { %2314 = vmatprep.mubr.msk.f32.mxu1 %vm2481_vm1, %v2480_v8 }
 0x86f   :  { %v1220_v57 = vpop.f32.mrb[4].mxu0 }
 0x870   :  { %v2291_v58 = vpop.f32.mrb[5].mxu0  ;;  %2299 = vmatprep.mubr.msk.f32.mxu0 %vm146_vm2, %v1220_v57 }
 0x871   :  { %v1951_v58 = vld [vmem:[%s2857_s9 + $0x18] sm:$0xff] }
 0x873   :  { %v1296_v59 = vpop.f32.mrb[20].mxu1 }
 0x874   :  { %v2296_v60 = vpop.f32.mrb[21].mxu1  ;;  %2300 = vmatmul.mubr.msk.f32.vlgmr.msra.gmra.mrb[2].mxu0 %vm146_vm2, %v1296_v59  ;;  %v2393_v59 = vpack.c.bf16 %v1951_v58, %v1950_v56 }
 0x875   :  { %2308 = vmatpush3.xpose.msk.msra.mxu0 %vm146_vm2, %v1464_v54  ;;  %2309 = vmatprep.mubr.msk.f32.mxu0 %vm2481_vm1, %v2480_v8  ;;  %v1948_v54 = vld [vmem:[%s2857_s9] sm:$0xff] }
 0x876   :  { %2317 = vmatprep.subr.mxu0 %v2480_v8  ;;  %v2389_v57 = vpack.c.bf16 %v1949_v55, %v1948_v54  ;;  %v1952_v60 = vld [vmem:[%s2857_s9 + $0x20] sm:$0xff] }
 0x877   :  { %v1457_v62 = vpop.f32.mrb[22].mxu1 }
 0x878   :  { %v1539_v63 = vmul.f32 0.35355338, %v1457_v62  ;;  %v2306_v0 = vpop.f32.mrb[23].mxu1  ;;  %2310 = vmatmul.mubr.msk.f32.vlgmr.msra.gmra.mrb[6].mxu0 %vm146_vm2, %v1462_v61  ;;  %v1953_v61 = vld [vmem:[%s2857_s9 + $0x28] sm:$0xff] }
 0x879   :  { %2319 = vmatprep.mubr.msk.f32.mxu0 %vm2481_vm1, %v2480_v8  ;;  %v2397_v62 = vpack.c.bf16 %v1953_v61, %v1952_v60  ;;  %v1955_v0 = vld [vmem:[%s2857_s9 + $0x38] sm:$0xff] }
 0x87a   :  { %v1541_v1 = vsel %vm146_vm2, %v1539_v63, -inf }
 0x87b   :  { %1542 = vmax.xlane.f32.xlu0 %v1541_v1 }
 0x908   :  { %v1543_v2 = vpop.xlane.xlu0 %1542 }
 0x909   :  { %v1547_v3 = vsub.f32 %v1539_v63, %v1543_v2  ;;  %v1954_v63 = vld [vmem:[%s2857_s9 + $0x30] sm:$0xff]  ;;  %v1956_v2 = vld [vmem:[%s2857_s9 + $0x40] sm:$0xff] }
 0x90a   :  { %v2401_v1 = vpack.c.bf16 %v1955_v0, %v1954_v63  ;;  %v2140_v63 = vld [vmem:[%s2862_s11] ss:$0 sm:$0xff] }
 0x90b   :  { %v1549_v4 = vmul.f32 1.442695, %v1547_v3  ;;  %v1957_v3 = vld [vmem:[%s2857_s9 + $0x48] sm:$0xff] }
 0x90d   :  { %2464 = vpow2.f32 %v1549_v4  ;;  %v2405_v4 = vpack.c.bf16 %v1957_v3, %v1956_v2  ;;  %v2141_v2 = vld [vmem:[%s2863_s12] ss:$0 sm:$0xff] }
 0x917   :  { %v2465_v6 = vpop.eup %2464 }
 0x918   :  { %v1553_v9 = vsel %vm146_vm2, %v2465_v6, 0.0 }
 0x919   :  { %1554 = vadd.xlane.f32.xlu0 %v1553_v9  ;;  %v1959_v9 = vld [vmem:[%s2857_s9 + $0x58] sm:$0xff] }
 0x94b   :  { %v1535_v10 = vpop.f32.mrb[6].mxu0 }
 0x94c   :  { %v1540_v11 = vmul.f32 0.35355338, %v1535_v10  ;;  %v2311_v14 = vpop.f32.mrb[7].mxu0 }
 0x94d   :  { %v1961_v14 = vld [vmem:[%s2857_s9 + $0x68] sm:$0xff] }
 0x94e   :  { %v1544_v15 = vsel %vm146_vm2, %v1540_v11, -inf }
 0x94f   :  { %1545 = vmax.xlane.f32.xlu1 %v1544_v15 }
 0x960   :  { %1563 = vrot.lane.b32.xlu1 %v2598_v12, %s2492_s18  ;;  %v142_v12 = vld [vmem:[%s2854_s3 + $0x18] sm:$0xff] }
 0x9a6   :  { %v1555_v8 = vpop.xlane.xlu0 %1554 }
 0x9a7   :  { %2466 = vrcp.f32 %v1555_v8 }
 0x9b1   :  { %v2467_v17 = vpop.eup %2466 }
 0x9b2   :  { %v1560_v20 = vmul.f32 %v2467_v17, %v2465_v6  ;;  %v1958_v6 = vld [vmem:[%s2857_s9 + $0x50] sm:$0xff] }
 0x9b3   :  { %v2409_v10 = vpack.c.bf16 %v1959_v9, %v1958_v6 }
 0x9dc   :  { %v1546_v16 = vpop.xlane.xlu1 %1545 }
 0x9dd   :  { %v1548_v18 = vsub.f32 %v1540_v11, %v1546_v16  ;;  %v1960_v11 = vld [vmem:[%s2857_s9 + $0x60] sm:$0xff] }
 0x9de   :  { %v2413_v15 = vpack.c.bf16 %v1961_v14, %v1960_v11 }
 0x9df   :  { %v1551_v19 = vmul.f32 1.442695, %v1548_v18 }
 0x9e0   :  { %v1564_v21 = vpop.permute.xlu1 %1563 }
 0x9e1   :  { %2468 = vpow2.f32 %v1551_v19  ;;  %2313 = vmatpush3.msra.mxu1 %v1564_v21 }
 0x9e2   :  { %2315 = vmatmul.mubr.msk.f32.vlgmr.msra.gmra.mrb[24].mxu1 %vm146_vm2, %v1560_v20  ;;  %2382 = vmatprep.subr.bf16.mxu1 %v2381_v50 }
 0x9e3   :  { %2384 = vmatpush3.bf16.msra.mxu1 %v2381_v50 }
 0x9e4   :  { %2386 = vmatprep.subr.bf16.mxu1 %v2385_v53 }
 0x9e7   :  { %2388 = vmatpush3.bf16.msra.mxu1 %v2385_v53 }
 0x9eb   :  { %v2469_v22 = vpop.eup %2468 }
 0x9ec   :  { %v1556_v23 = vsel %vm146_vm2, %v2469_v22, 0.0 }
 0x9ed   :  { %1557 = vadd.xlane.f32.xlu0 %v1556_v23 }
 0xa03   :  { %1639 = vrot.lane.b32.xlu0 %v2601_v13, %s2492_s18 }
 0xa7a   :  { %v1558_v24 = vpop.xlane.xlu0 %1557 }
 0xa7b   :  { %2470 = vrcp.f32 %v1558_v24 }
 0xa7e   :  { %v1640_v25 = vpop.permute.xlu0 %1639 }
 0xa7f   :  { %2318 = vmatpush3.msra.mxu0 %v1640_v25  ;;  %v2135_v25 = vld [vmem:[%s2859_s6] ss:$0 sm:$0xff] }
 0xa80   :  { %2322 = vmatprep.subr.mxu0 %v142_v12 }
 0xa85   :  { %v2471_v26 = vpop.eup %2470 }
 0xa86   :  { %v1562_v27 = vmul.f32 %v2471_v26, %v2469_v22  ;;  %v2134_v22 = vld [vmem:[%s2858_s5] ss:$0 sm:$0xff] }
 0xa88   :  { %2320 = vmatmul.mubr.msk.f32.vlgmr.msra.gmra.mrb[8].mxu0 %vm146_vm2, %v1562_v27 }
 0xa89   :  { %2323 = vmatpush3.msra.mxu0 %v142_v12 }
 0xa8a   :  { %2390 = vmatprep.subr.bf16.mxu0 %v2389_v57 }
 0xab5   :  { %v1635_v28 = vpop.f32.mrb[24].mxu1 }
 0xab6   :  { %v2316_v29 = vpop.f32.mrb[25].mxu1  ;;  %2324 = vmatprep.mubr.msk.f32.mxu0 %vm146_vm2, %v1635_v28 }
 0xb5b   :  { %v1711_v30 = vpop.f32.mrb[8].mxu0 }
 0xb5c   :  { %v2321_v13 = vpop.f32.mrb[9].mxu0  ;;  %2325 = vmatmul.mubr.msk.f32.vlgmr.msra.gmra.mrb[2].mxu0 %vm146_vm2, %v1711_v30  ;;  %v1962_v30 = vld [vmem:[%s2857_s9 + $0x70] sm:$0xff] }
 0xb5d   :  { %2392 = vmatpush3.bf16.msra.mxu0 %v2389_v57  ;;  %v1963_v13 = vld [vmem:[%s2857_s9 + $0x78] sm:$0xff] }
 0xb5e   :  { %2394 = vmatprep.subr.bf16.mxu0 %v2393_v59 }
 0xb61   :  { %2396 = vmatpush3.bf16.msra.mxu0 %v2393_v59 }
 0xb62   :  { %2398 = vmatprep.subr.bf16.mxu0 %v2397_v62 }
 0xb65   :  { %2400 = vmatpush3.bf16.msra.mxu0 %v2397_v62 }
 0xb66   :  { %2402 = vmatprep.subr.bf16.mxu0 %v2401_v1 }
 0xb69   :  { %2404 = vmatpush3.bf16.msra.mxu0 %v2401_v1 }
 0xb6a   :  { %2406 = vmatprep.subr.bf16.mxu0 %v2405_v4 }
 0xb6d   :  { %2408 = vmatpush3.bf16.msra.mxu0 %v2405_v4 }
 0xb6e   :  { %2410 = vmatprep.subr.bf16.mxu0 %v2409_v10 }
 0xb71   :  { %2412 = vmatpush3.bf16.msra.mxu0 %v2409_v10 }
 0xb72   :  { %2414 = vmatprep.subr.bf16.mxu0 %v2413_v15 }
 0xb75   :  { %2416 = vmatpush3.bf16.msra.mxu0 %v2413_v15 }
 0xc2f   :  { %v2326_v32 = vpop.f32.mrb[2].mxu0 }
 0xc30   :  { %v1806_v33 = vadd.f32 %v2326_v32, %v2133_v31  ;;  %v1787_v34 = vpop.f32.mrb[3].mxu0  ;;  %v2136_v32 = vld [vmem:[%s2860_s8] ss:$0 sm:$0xff] }
 0xc31   :  { %v1805_v35 = vadd.f32 %v2133_v31, %v1787_v34  ;;  %v2417_v31 = vpack.c.bf16 %v1963_v13, %v1962_v30 }
 0xc32   :  { %v1808_v36 = vadd.f32 %v1806_v33, %v2585_v7 }
 0xc33   :  { %v1807_v37 = vadd.f32 %v1805_v35, %v2578_v5  ;;  %2418 = vmatprep.subr.bf16.mxu0 %v2417_v31 }
 0xc34   :  { %v1814_v38 = vsel %vm57_vm0, %v1808_v36, 0.0  ;;  %2420 = vmatpush3.bf16.msra.mxu0 %v2417_v31 }
 0xc35   :  { %1815 = vadd.xlane.f32.xlu0 %v1814_v38  ;;  %v1811_v39 = vsel %vm57_vm0, %v1807_v37, 0.0 }
 0xc36   :  { %1812 = vadd.xlane.f32.xlu1 %v1811_v39  ;;  %v2139_v39 = vld [vmem:[%s2861_s10] ss:$0 sm:$0xff] }
 0xcc2   :  { %v1816_v40 = vpop.xlane.xlu0 %1815 }
 0xcc3   :  { %v1819_v41 = vmul.f32 0.03125, %v1816_v40  ;;  %v1813_v42 = vpop.xlane.xlu1 %1812 }
 0xcc4   :  { %v1818_v43 = vmul.f32 0.03125, %v1813_v42 }
 0xcc5   :  { %v2747_v44 = vsub.f32 %v1808_v36, %v1819_v41 }
 0xcc6   :  { %v2749_v45 = vsub.f32 %v1807_v37, %v1818_v43 }
 0xcc7   :  { %v1823_v46 = vmul.f32 %v2747_v44, %v2747_v44 }
 0xcc8   :  { %v1822_v5 = vmul.f32 %v2749_v45, %v2749_v45 }
 0xcc9   :  { %v1827_v7 = vsel %vm57_vm0, %v1823_v46, 0.0 }
 0xcca   :  { %1828 = vadd.xlane.f32.xlu0 %v1827_v7  ;;  %v1824_v47 = vsel %vm57_vm0, %v1822_v5, 0.0 }
 0xccb   :  { %1825 = vadd.xlane.f32.xlu1 %v1824_v47 }
 0xd57   :  { %v1829_v8 = vpop.xlane.xlu0 %1828 }
 0xd58   :  { %v1831_v16 = vmul.f32 0.03125, %v1829_v8  ;;  %v1826_v17 = vpop.xlane.xlu1 %1825 }
 0xd59   :  { %v1830_v18 = vmul.f32 0.03125, %v1826_v17 }
 0xd5a   :  { %v1833_v19 = vadd.f32 1e-05, %v1831_v16 }
 0xd5b   :  { %v1832_v20 = vadd.f32 1e-05, %v1830_v18 }
 0xd5c   :  { %2472 = vrsqrt.f32 %v1833_v19 }
 0xd5d   :  { %2474 = vrsqrt.f32 %v1832_v20 }
 0xd66   :  { %v2473_v21 = vpop.eup %2472 }
 0xd67   :  { %v2475_v23 = vpop.eup %2474  ;;  %v1837_v24 = vmul.f32 %v2473_v21, %v2747_v44 }
 0xd68   :  { %v1836_v12 = vmul.f32 %v2475_v23, %v2749_v45 }
 0xd69   :  { %v1845_v26 = vmul.f32 %v2134_v22, %v1837_v24 }
 0xd6a   :  { %v1844_v27 = vmul.f32 %v2134_v22, %v1836_v12 }
 0xd6b   :  { %v1853_v29 = vadd.f32 %v2135_v25, %v1845_v26 }
 0xd6c   :  { %v1852_v28 = vadd.f32 %v2135_v25, %v1844_v27 }
 0xd6e   :  { %2335 = vmatprep.mubr.msk.f32.mxu1 %vm57_vm0, %v1852_v28 }
 0xd6f   :  { %2336 = vmatmul.mubr.msk.f32.vlgmr.msra.gmra.mrb[26].mxu1 %vm57_vm0, %v1853_v29 }
 0xe42   :  { %v2337_v33 = vpop.f32.mrb[26].mxu1 }
 0xe43   :  { %v1943_v34 = vadd.f32 %v2337_v33, %v2136_v32  ;;  %v1937_v35 = vpop.f32.mrb[27].mxu1 }
 0xe44   :  { %v1938_v36 = vadd.f32 %v2136_v32, %v1937_v35 }
 0xe45   :  { %v1947_v38 = vmax.f32 %v1943_v34, 0.0 }
 0xe46   :  { %v1946_v37 = vmax.f32 %v1938_v36, 0.0 }
 0xe48   :  { %2370 = vmatprep.mubr.f32.mxu0 %v1946_v37 }
 0xe49   :  { %2371 = vmatmul.mubr.f32.vlgmr.msra.gmra.mrb[10].mxu0 %v1947_v38 }
 0xf1c   :  { %v2372_v40 = vpop.f32.mrb[10].mxu0 }
 0xf1d   :  { %v2043_v41 = vadd.f32 %v2372_v40, %v2139_v39  ;;  %v2037_v42 = vpop.f32.mrb[11].mxu0 }
 0xf1e   :  { %v2038_v43 = vadd.f32 %v2139_v39, %v2037_v42 }
 0xf1f   :  { %v2047_v44 = vadd.f32 %v2043_v41, %v1853_v29 }
 0xf20   :  { %v2046_v45 = vadd.f32 %v2038_v43, %v1852_v28 }
 0xf21   :  { %v2053_v46 = vsel %vm57_vm0, %v2047_v44, 0.0 }
 0xf22   :  { %2054 = vadd.xlane.f32.xlu0 %v2053_v46  ;;  %v2050_v5 = vsel %vm57_vm0, %v2046_v45, 0.0 }
 0xf23   :  { %2051 = vadd.xlane.f32.xlu1 %v2050_v5 }
 0xfaf   :  { %v2055_v7 = vpop.xlane.xlu0 %2054 }
 0xfb0   :  { %v2057_v47 = vmul.f32 0.03125, %v2055_v7  ;;  %v2052_v48 = vpop.xlane.xlu1 %2051 }
 0xfb1   :  { %v2056_v49 = vmul.f32 0.03125, %v2052_v48 }
 0xfb2   :  { %v2059_v50 = vsub.f32 %v2047_v44, %v2057_v47 }
 0xfb3   :  { %v2058_v51 = vsub.f32 %v2046_v45, %v2056_v49 }
 0xfb4   :  { %v2061_v52 = vmul.f32 %v2059_v50, %v2059_v50 }
 0xfb5   :  { %v2060_v53 = vmul.f32 %v2058_v51, %v2058_v51 }
 0xfb6   :  { %v2065_v54 = vsel %vm57_vm0, %v2061_v52, 0.0 }
 0xfb7   :  { %2066 = vadd.xlane.f32.xlu0 %v2065_v54  ;;  %v2062_v55 = vsel %vm57_vm0, %v2060_v53, 0.0 }
 0xfb8   :  { %2063 = vadd.xlane.f32.xlu1 %v2062_v55 }
0x1044   :  { %v2067_v56 = vpop.xlane.xlu0 %2066 }
0x1045   :  { %v2069_v57 = vmul.f32 0.03125, %v2067_v56  ;;  %v2064_v58 = vpop.xlane.xlu1 %2063 }
0x1046   :  { %v2068_v59 = vmul.f32 0.03125, %v2064_v58 }
0x1047   :  { %v2071_v60 = vadd.f32 1e-05, %v2069_v57 }
0x1048   :  { %v2070_v61 = vadd.f32 1e-05, %v2068_v59 }
0x1049   :  { %2476 = vrsqrt.f32 %v2071_v60 }
0x104a   :  { %2478 = vrsqrt.f32 %v2070_v61 }
0x1053   :  { %v2477_v62 = vpop.eup %2476 }
0x1054   :  { %v2479_v0 = vpop.eup %2478  ;;  %v2075_v1 = vmul.f32 %v2477_v62, %v2059_v50 }
0x1055   :  { %v2074_v3 = vmul.f32 %v2479_v0, %v2058_v51 }
0x1056   :  { %v2083_v4 = vmul.f32 %v2140_v63, %v2075_v1 }
0x1057   :  { %v2082_v6 = vmul.f32 %v2140_v63, %v2074_v3 }
0x1058   :  { %v2091_v9 = vadd.f32 %v2141_v2, %v2083_v4 }
0x1059   :  { %v2090_v10 = vadd.f32 %v2141_v2, %v2082_v6 }
0x105a   :  { %2093 = vst.msk [vmem:[%s2864_s13 + $0x8] sm:$0xff] %vm57_vm0, %v2091_v9 }
0x105b   :  { %2092 = vst.msk [vmem:[%s2864_s13] sm:$0xff] %vm57_vm0, %v2090_v10 }

</bundles_post_ra>
